<compile_context>
chip_gen: v5e
topology: v5e:2x2
jax: 0.10.0
libtpu: 0.0.40
codegen_flags: <defaults>
</compile_context>

<pallas_src>
import jax
import jax.numpy as jnp
from jax.experimental import pallas as pl
from jax.experimental.pallas import tpu as pltpu


def _round_up(n, m):
    return ((n + m - 1) // m) * m


def _pad2(a, rows, cols):
    return jnp.pad(a, ((0, rows - a.shape[0]), (0, cols - a.shape[1])))


def _make_kernel(latent, H, compute_dtype):
    def kernel(x_ref, w1_ref, b1_ref, w2_ref, b2_ref, wh_ref, bh_ref, out_ref):
        # x arrives un-padded in f32; cast to the MXU operand dtype in-kernel.
        x = x_ref[...].astype(compute_dtype)

        # Linear(ins, outs) + ReLU  (f32 MXU accumulation, f32 epilogue --
        # safe on v5e which lacks bf16 VPU/EUP).
        h1 = jnp.dot(x, w1_ref[...], preferred_element_type=jnp.float32) + b1_ref[...]
        h1 = jnp.maximum(h1, 0.0)

        # Linear(outs, outs) + ReLU
        h2 = jnp.dot(h1.astype(compute_dtype), w2_ref[...],
                     preferred_element_type=jnp.float32) + b2_ref[...]
        h2 = jnp.maximum(h2, 0.0)

        # Fused [mu | var] head: one MXU push.
        v = jnp.dot(h2.astype(compute_dtype), wh_ref[...],
                    preferred_element_type=jnp.float32) + bh_ref[...]
        # Numerically stable softplus, applied only to the var half
        # (columns >= latent).  Padding columns are sliced away in the wrapper.
        sp = jnp.maximum(v, 0.0) + jnp.log1p(jnp.exp(-jnp.abs(v))) + 1e-8
        col = jax.lax.broadcasted_iota(jnp.int32, v.shape, 1)
        heads = jnp.where(col >= latent, sp, v)

        # One fused, lane-dense output slab: columns [0,H) = mlp(h2),
        # columns [H, H+L2) = [mu | var].  Both stores are 128-aligned and
        # 128-wide multiples -> unmasked vst.
        out_ref[:, :H] = h2.astype(out_ref.dtype)
        out_ref[:, H:] = heads.astype(out_ref.dtype)

    return kernel


def prepare_params(params, compute_dtype=jnp.bfloat16):
    """One-time weight prep: pad N (lane) dims to 128, fuse the mu/var head,
    cast matmul operands.  Call once and reuse across forward calls."""
    ins, outs = params["w1"].shape
    latent = params["wmu"].shape[1]
    H = _round_up(outs, 128)          # hidden / mlp-output lane width
    L2 = _round_up(2 * latent, 128)   # fused [mu|var] lane width
    # Only the N dims are padded to 128; K dims keep their true size (no
    # zero-FLOP / zero-DMA inflation beyond the 128-lane minimum).
    w1 = _pad2(params["w1"], ins, H).astype(compute_dtype)   # (ins, H)
    b1 = _pad2(params["b1"], 1, H).astype(jnp.float32)
    w2 = _pad2(params["w2"], H, H).astype(compute_dtype)     # (H, H)
    b2 = _pad2(params["b2"], 1, H).astype(jnp.float32)
    wh = _pad2(jnp.concatenate([params["wmu"], params["wvar"]], axis=1),
               H, L2).astype(compute_dtype)                  # (H, L2)
    bh = _pad2(jnp.concatenate([params["bmu"], params["bvar"]], axis=1),
               1, L2).astype(jnp.float32)
    return dict(w1=w1, b1=b1, w2=w2, b2=b2, wh=wh, bh=bh,
                ins=ins, outs=outs, latent=latent, H=H, L2=L2,
                compute_dtype=jnp.dtype(compute_dtype))


def mlp_forward(x, prepped, *, tile_b=None, num_tensorcores=1, out_dtype=None):
    """x: [B, ins] float32.  prepped: output of prepare_params().

    num_tensorcores: 1 for v5e/v6e (grid is a serial loop -> one big step for
    small/medium batches), 2 for v7x (balanced 2-way batch split, sharded
    across both TensorCores via dimension_semantics=("parallel",)).

    Returns (mlp [B, outs], mu [B, latent], var [B, latent]) in out_dtype
    (defaults to the compute dtype to halve output writeback bytes).
    """
    B, ins = x.shape
    assert ins == prepped["ins"], "input feature dim mismatch with prepared params"
    outs, latent = prepped["outs"], prepped["latent"]
    H, L2 = prepped["H"], prepped["L2"]
    compute_dtype = prepped["compute_dtype"]
    out_dtype = jnp.dtype(compute_dtype if out_dtype is None else out_dtype)

    # Native sublane packing: 8 rows f32, 16 rows bf16, 32 rows int8/fp8.
    row_align = max(8, 32 // jnp.dtype(compute_dtype).itemsize)
    Bp = _round_up(B, row_align)

    if tile_b is None:
        if num_tensorcores > 1:
            # v7x: balanced split so both TensorCores get work.
            tile_b = _round_up(pl.cdiv(Bp, num_tensorcores), row_align)
        else:
            # v5e/v6e: the grid is a serial loop -> avoid extra steps.
            tile_b = Bp
    tile_b = max(row_align, _round_up(int(tile_b), row_align))
    tile_b = min(tile_b, Bp, 1024)   # cap keeps activation tiles small in VMEM
    grid = (pl.cdiv(Bp, tile_b),)

    # Tiny alignment-only pad (< row_align rows); no-op for aligned batches.
    x_in = x if Bp == B else jnp.pad(x, ((0, Bp - B), (0, 0)))

    def batch_spec(cols):
        return pl.BlockSpec((tile_b, cols), lambda i: (i, 0))

    def shared_spec(rows, cols):
        # Constant index_map: block never changes across the grid, so weights
        # and biases stay resident in VMEM (no per-step re-DMA).
        return pl.BlockSpec((rows, cols), lambda i: (0, 0))

    # VMEM budget check (double-buffered operands).  Only matters for large H.
    c_item = jnp.dtype(compute_dtype).itemsize
    o_item = out_dtype.itemsize
    weight_bytes = (ins * H + H * H + H * L2) * c_item + (2 * H + L2) * 4
    act_bytes = tile_b * ins * x.dtype.itemsize + tile_b * (H + L2) * o_item
    vmem_est = 2 * (weight_bytes + act_bytes)
    compiler_kwargs = dict(dimension_semantics=("parallel",))
    if vmem_est > 16 * 1024 * 1024:
        # TODO(synk): for very large H (w2 ~ H*H approaching v7x's 64 MiB VMEM),
        # single-buffer the resident weight specs and/or add a K/N grid axis
        # with a VMEM accumulator instead of whole-matrix residency.
        compiler_kwargs["vmem_limit_bytes"] = int(
            min(vmem_est * 5 // 4, 100 * 1024 * 1024))

    slab = pl.pallas_call(
        _make_kernel(latent, H, compute_dtype),
        out_shape=jax.ShapeDtypeStruct((Bp, H + L2), out_dtype),
        grid_spec=pltpu.PrefetchScalarGridSpec(
            num_scalar_prefetch=0,
            grid=grid,
            in_specs=[
                batch_spec(ins),        # x (un-padded lanes; cast in-kernel)
                shared_spec(ins, H),    # w1
                shared_spec(1, H),      # b1
                shared_spec(H, H),      # w2
                shared_spec(1, H),      # b2
                shared_spec(H, L2),     # w_heads = [wmu | wvar]
                shared_spec(1, L2),     # b_heads = [bmu | bvar]
            ],
            out_specs=batch_spec(H + L2),   # fused [mlp | mu | var] slab
        ),
        compiler_params=pltpu.CompilerParams(**compiler_kwargs),
    )(x_in, prepped["w1"], prepped["b1"], prepped["w2"], prepped["b2"],
      prepped["wh"], prepped["bh"])

    mlp_out = slab[:B, :outs]
    mu = slab[:B, H:H + latent]
    var = slab[:B, H + latent:H + 2 * latent]
    return mlp_out, mu, var


def init_params(key, ins, outs, latent):
    """Deterministic synthetic parameters (PyTorch-style uniform fan-in init)."""
    ks = jax.random.split(key, 8)

    def lin(kw, kb, fan_in, fan_out):
        bound = 1.0 / jnp.sqrt(fan_in)
        w = jax.random.uniform(kw, (fan_in, fan_out), jnp.float32, -bound, bound)
        b = jax.random.uniform(kb, (1, fan_out), jnp.float32, -bound, bound)
        return w, b

    w1, b1 = lin(ks[0], ks[1], ins, outs)
    w2, b2 = lin(ks[2], ks[3], outs, outs)
    wmu, bmu = lin(ks[4], ks[5], outs, latent)
    wvar, bvar = lin(ks[6], ks[7], outs, latent)
    return dict(w1=w1, b1=b1, w2=w2, b2=b2,
                wmu=wmu, bmu=bmu, wvar=wvar, bvar=bvar)


def mlp_reference(x, p):
    h1 = jnp.maximum(x @ p["w1"] + p["b1"], 0.0)
    h2 = jnp.maximum(h1 @ p["w2"] + p["b2"], 0.0)
    mu = h2 @ p["wmu"] + p["bmu"]
    v = h2 @ p["wvar"] + p["bvar"]
    var = jax.nn.softplus(v) + 1e-8
    return h2, mu, var


if __name__ == "__main__":
    key = jax.random.PRNGKey(0)
    kx, kp, kx2, kx3 = jax.random.split(key, 4)

    INS, OUTS, LATENT = 32, 64, 16
    params = init_params(kp, INS, OUTS, LATENT)
    # Weight prep done ONCE (padding / head fusion / cast), reused across calls.
    prep_f32 = prepare_params(params, compute_dtype=jnp.float32)
    prep_bf16 = prepare_params(params, compute_dtype=jnp.bfloat16)

    x = jax.random.normal(kx, (256, INS), jnp.float32)
    mlp_ref, mu_ref, var_ref = mlp_reference(x, params)

    # f32 operands / f32 outputs, single grid step (v5e/v6e-style): tight check.
    mlp_f32, mu_f32, var_f32 = mlp_forward(x, prep_f32)
    jax.block_until_ready((mlp_f32, mu_f32, var_f32))
    assert mlp_f32.dtype == jnp.float32
    assert jnp.allclose(mlp_f32, mlp_ref, atol=1e-4, rtol=1e-4)
    assert jnp.allclose(mu_f32, mu_ref, atol=1e-4, rtol=1e-4)
    assert jnp.allclose(var_f32, var_ref, atol=1e-4, rtol=1e-4)
    assert bool(jnp.all(var_f32 > 0.0))

    # bf16 operands / bf16 outputs (default on v6e/v7x): loose tolerance.
    mlp_bf, mu_bf, var_bf = mlp_forward(x, prep_bf16)
    jax.block_until_ready((mlp_bf, mu_bf, var_bf))
    assert mlp_bf.dtype == jnp.bfloat16
    assert jnp.allclose(mlp_bf.astype(jnp.float32), mlp_ref, atol=2e-1, rtol=5e-2)
    assert jnp.allclose(mu_bf.astype(jnp.float32), mu_ref, atol=2e-1, rtol=5e-2)
    assert jnp.allclose(var_bf.astype(jnp.float32), var_ref, atol=2e-1, rtol=5e-2)
    assert bool(jnp.all(var_bf.astype(jnp.float32) > 0.0))

    # v7x-style 2-way batch split (parallel grid); runs fine serially elsewhere.
    mlp_2, mu_2, var_2 = mlp_forward(x, prep_bf16, num_tensorcores=2)
    jax.block_until_ready((mlp_2, mu_2, var_2))
    assert jnp.allclose(mlp_2.astype(jnp.float32), mlp_ref, atol=2e-1, rtol=5e-2)
    assert jnp.allclose(mu_2.astype(jnp.float32), mu_ref, atol=2e-1, rtol=5e-2)
    assert jnp.allclose(var_2.astype(jnp.float32), var_ref, atol=2e-1, rtol=5e-2)

    # Ragged multi-step grid: B=200 with tile_b=64 -> 4 steps, last block partial.
    x_r = jax.random.normal(kx3, (200, INS), jnp.float32)
    mlp_r, mu_r, var_r = mlp_forward(x_r, prep_f32, tile_b=64)
    jax.block_until_ready((mlp_r, mu_r, var_r))
    mlp_rr, mu_rr, var_rr = mlp_reference(x_r, params)
    assert mlp_r.shape == (200, OUTS) and mu_r.shape == (200, LATENT)
    assert jnp.allclose(mlp_r, mlp_rr, atol=1e-4, rtol=1e-4)
    assert jnp.allclose(mu_r, mu_rr, atol=1e-4, rtol=1e-4)
    assert jnp.allclose(var_r, var_rr, atol=1e-4, rtol=1e-4)

    # Tiny batch B=10: only a <=6-row sublane-alignment pad, sliced back.
    x_small = jax.random.normal(kx2, (10, INS), jnp.float32)
    mlp_s, mu_s, var_s = mlp_forward(x_small, prep_f32, tile_b=8)
    jax.block_until_ready((mlp_s, mu_s, var_s))
    mlp_sr, mu_sr, var_sr = mlp_reference(x_small, params)
    assert mlp_s.shape == (10, OUTS) and mu_s.shape == (10, LATENT)
    assert jnp.allclose(mlp_s, mlp_sr, atol=1e-4, rtol=1e-4)
    assert jnp.allclose(mu_s, mu_sr, atol=1e-4, rtol=1e-4)
    assert jnp.allclose(var_s, var_sr, atol=1e-4, rtol=1e-4)

    print("KERNEL_OK")
</pallas_src>

<mosaic_0001>
module attributes {stable_mosaic.version = 11 : i64} {
  func.func @kernel(%arg0: i32, %arg1: memref<256x32xf32, #tpu.memory_space<vmem>>, %arg2: memref<32x128xf32, #tpu.memory_space<vmem>>, %arg3: memref<1x128xf32, #tpu.memory_space<vmem>>, %arg4: memref<128x128xf32, #tpu.memory_space<vmem>>, %arg5: memref<1x128xf32, #tpu.memory_space<vmem>>, %arg6: memref<128x128xf32, #tpu.memory_space<vmem>>, %arg7: memref<1x128xf32, #tpu.memory_space<vmem>>, %arg8: memref<256x256xf32, #tpu.memory_space<vmem>>) attributes {dimension_semantics = [#tpu.dimension_semantics<parallel>], iteration_bounds = array<i64: 1>, scalar_prefetch = 0 : i64, scratch_operands = 0 : i64, tpu.core_type = #tpu.core_type<tc>, window_params = [{transform_indices = @transform_0, window_bounds = array<i64: 256, 32>}, {pipeline_mode = #tpu.pipeline_mode<synchronous>, transform_indices = @transform_1, window_bounds = array<i64: 32, 128>}, {pipeline_mode = #tpu.pipeline_mode<synchronous>, transform_indices = @transform_2, window_bounds = array<i64: 1, 128>}, {pipeline_mode = #tpu.pipeline_mode<synchronous>, transform_indices = @transform_3, window_bounds = array<i64: 128, 128>}, {pipeline_mode = #tpu.pipeline_mode<synchronous>, transform_indices = @transform_4, window_bounds = array<i64: 1, 128>}, {pipeline_mode = #tpu.pipeline_mode<synchronous>, transform_indices = @transform_5, window_bounds = array<i64: 128, 128>}, {pipeline_mode = #tpu.pipeline_mode<synchronous>, transform_indices = @transform_6, window_bounds = array<i64: 1, 128>}, {transform_indices = @transform_7, window_bounds = array<i64: 256, 256>}]} {
    %c0 = arith.constant 0 : index
    %c0_0 = arith.constant 0 : index
    %0 = vector.load %arg1[%c0, %c0_0] : memref<256x32xf32, #tpu.memory_space<vmem>>, vector<256x32xf32>
    %c0_1 = arith.constant 0 : index
    %c0_2 = arith.constant 0 : index
    %1 = vector.load %arg2[%c0_1, %c0_2] : memref<32x128xf32, #tpu.memory_space<vmem>>, vector<32x128xf32>
    %cst = arith.constant dense<0.000000e+00> : vector<256x128xf32>
    %2 = tpu.matmul %0, %1, %cst {dimension_numbers = #tpu.dot_dimension_numbers<[1], [0], [0], [1], [0, 0, 1, 1], [], []>} : vector<256x32xf32>, vector<32x128xf32>, vector<256x128xf32> -> vector<256x128xf32>
    %c0_3 = arith.constant 0 : index
    %c0_4 = arith.constant 0 : index
    %3 = vector.load %arg3[%c0_3, %c0_4] : memref<1x128xf32, #tpu.memory_space<vmem>>, vector<1x128xf32>
    %4 = vector.broadcast %3 : vector<1x128xf32> to vector<256x128xf32>
    %5 = arith.addf %2, %4 : vector<256x128xf32>
    %cst_5 = arith.constant 0.000000e+00 : f32
    %6 = vector.broadcast %cst_5 : f32 to vector<256x128xf32>
    %7 = arith.maximumf %5, %6 : vector<256x128xf32>
    %c0_6 = arith.constant 0 : index
    %c0_7 = arith.constant 0 : index
    %8 = vector.load %arg4[%c0_6, %c0_7] : memref<128x128xf32, #tpu.memory_space<vmem>>, vector<128x128xf32>
    %cst_8 = arith.constant dense<0.000000e+00> : vector<256x128xf32>
    %9 = tpu.matmul %7, %8, %cst_8 {dimension_numbers = #tpu.dot_dimension_numbers<[1], [0], [0], [1], [0, 0, 1, 1], [], []>} : vector<256x128xf32>, vector<128x128xf32>, vector<256x128xf32> -> vector<256x128xf32>
    %c0_9 = arith.constant 0 : index
    %c0_10 = arith.constant 0 : index
    %10 = vector.load %arg5[%c0_9, %c0_10] : memref<1x128xf32, #tpu.memory_space<vmem>>, vector<1x128xf32>
    %11 = vector.broadcast %10 : vector<1x128xf32> to vector<256x128xf32>
    %12 = arith.addf %9, %11 : vector<256x128xf32>
    %cst_11 = arith.constant 0.000000e+00 : f32
    %13 = vector.broadcast %cst_11 : f32 to vector<256x128xf32>
    %14 = arith.maximumf %12, %13 : vector<256x128xf32>
    %c0_12 = arith.constant 0 : index
    %c0_13 = arith.constant 0 : index
    %15 = vector.load %arg6[%c0_12, %c0_13] : memref<128x128xf32, #tpu.memory_space<vmem>>, vector<128x128xf32>
    %cst_14 = arith.constant dense<0.000000e+00> : vector<256x128xf32>
    %16 = tpu.matmul %14, %15, %cst_14 {dimension_numbers = #tpu.dot_dimension_numbers<[1], [0], [0], [1], [0, 0, 1, 1], [], []>} : vector<256x128xf32>, vector<128x128xf32>, vector<256x128xf32> -> vector<256x128xf32>
    %c0_15 = arith.constant 0 : index
    %c0_16 = arith.constant 0 : index
    %17 = vector.load %arg7[%c0_15, %c0_16] : memref<1x128xf32, #tpu.memory_space<vmem>>, vector<1x128xf32>
    %18 = vector.broadcast %17 : vector<1x128xf32> to vector<256x128xf32>
    %19 = arith.addf %16, %18 : vector<256x128xf32>
    %cst_17 = arith.constant 0.000000e+00 : f32
    %20 = vector.broadcast %cst_17 : f32 to vector<256x128xf32>
    %21 = arith.maximumf %19, %20 : vector<256x128xf32>
    %22 = math.absf %19 : vector<256x128xf32>
    %cst_18 = arith.constant 0.000000e+00 : f32
    %23 = vector.broadcast %cst_18 : f32 to vector<256x128xf32>
    %24 = arith.subf %23, %22 : vector<256x128xf32>
    %25 = math.exp %24 : vector<256x128xf32>
    %26 = math.log1p %25 : vector<256x128xf32>
    %27 = arith.addf %21, %26 : vector<256x128xf32>
    %cst_19 = arith.constant 9.99999993E-9 : f32
    %28 = vector.broadcast %cst_19 : f32 to vector<256x128xf32>
    %29 = arith.addf %27, %28 : vector<256x128xf32>
    %30 = tpu.iota {dimensions = array<i32: 1>} : vector<256x128xi32>
    %c16_i32 = arith.constant 16 : i32
    %31 = vector.broadcast %c16_i32 : i32 to vector<256x128xi32>
    %32 = arith.cmpi sge, %30, %31 : vector<256x128xi32>
    %33 = arith.select %32, %29, %19 : vector<256x128xi1>, vector<256x128xf32>
    %c0_20 = arith.constant 0 : index
    %c0_21 = arith.constant 0 : index
    %34 = vector.load %arg8[%c0_20, %c0_21] : memref<256x256xf32, #tpu.memory_space<vmem>>, vector<256x128xf32>
    tpu.vector_store %arg8[%c0_20, %c0_21], %14 {strides = array<i32>} : memref<256x256xf32, #tpu.memory_space<vmem>>, vector<256x128xf32>,
    %c0_22 = arith.constant 0 : index
    %c128 = arith.constant 128 : index
    %35 = vector.load %arg8[%c0_22, %c128] : memref<256x256xf32, #tpu.memory_space<vmem>>, vector<256x128xf32>
    tpu.vector_store %arg8[%c0_22, %c128], %33 {strides = array<i32>} : memref<256x256xf32, #tpu.memory_space<vmem>>, vector<256x128xf32>,
    return
  }
  func.func @transform_0(%arg0: i32) -> (i32, i32) {
    %c0_i32 = arith.constant 0 : i32
    %c0_i32_0 = arith.constant 0 : i32
    return %arg0, %c0_i32 : i32, i32
  }
  func.func @transform_1(%arg0: i32) -> (i32, i32) {
    %c0_i32 = arith.constant 0 : i32
    %c0_i32_0 = arith.constant 0 : i32
    %c0_i32_1 = arith.constant 0 : i32
    return %c0_i32, %c0_i32_0 : i32, i32
  }
  func.func @transform_2(%arg0: i32) -> (i32, i32) {
    %c0_i32 = arith.constant 0 : i32
    %c0_i32_0 = arith.constant 0 : i32
    %c0_i32_1 = arith.constant 0 : i32
    return %c0_i32, %c0_i32_0 : i32, i32
  }
  func.func @transform_3(%arg0: i32) -> (i32, i32) {
    %c0_i32 = arith.constant 0 : i32
    %c0_i32_0 = arith.constant 0 : i32
    %c0_i32_1 = arith.constant 0 : i32
    return %c0_i32, %c0_i32_0 : i32, i32
  }
  func.func @transform_4(%arg0: i32) -> (i32, i32) {
    %c0_i32 = arith.constant 0 : i32
    %c0_i32_0 = arith.constant 0 : i32
    %c0_i32_1 = arith.constant 0 : i32
    return %c0_i32, %c0_i32_0 : i32, i32
  }
  func.func @transform_5(%arg0: i32) -> (i32, i32) {
    %c0_i32 = arith.constant 0 : i32
    %c0_i32_0 = arith.constant 0 : i32
    %c0_i32_1 = arith.constant 0 : i32
    return %c0_i32, %c0_i32_0 : i32, i32
  }
  func.func @transform_6(%arg0: i32) -> (i32, i32) {
    %c0_i32 = arith.constant 0 : i32
    %c0_i32_0 = arith.constant 0 : i32
    %c0_i32_1 = arith.constant 0 : i32
    return %c0_i32, %c0_i32_0 : i32, i32
  }
  func.func @transform_7(%arg0: i32) -> (i32, i32) {
    %c0_i32 = arith.constant 0 : i32
    %c0_i32_0 = arith.constant 0 : i32
    return %arg0, %c0_i32 : i32, i32
  }
}

</mosaic_0001>

<bundles_post_ra>
// kernel: tpu_custom_call.1
= control target key start
LH: loop header
LB: loop body
LE: loop exit
PB: predicated region body
PF: predicated region fallthrough
CT: control target
= control target key end

     0   :  { %s2085_s0 = inlined_call_operand.vmem [shape: f32[256,32], index: 0, kind: input, shape index: {}]   ;;  %s2086_s1 = inlined_call_operand.vmem [shape: f32[32,128], index: 1, kind: input, shape index: {}]   ;;  %s2087_s2 = inlined_call_operand.vmem [shape: f32[1,128], index: 2, kind: input, shape index: {}]   ;;  %s2088_s3 = inlined_call_operand.vmem [shape: f32[128,128], index: 3, kind: input, shape index: {}]   ;;  %s2089_s4 = inlined_call_operand.vmem [shape: f32[1,128], index: 4, kind: input, shape index: {}]   ;;  %s2090_s5 = inlined_call_operand.vmem [shape: f32[128,128], index: 5, kind: input, shape index: {}]   ;;  %s2091_s6 = inlined_call_operand.vmem [shape: f32[1,128], index: 6, kind: input, shape index: {}]   ;;  %s2092_s7 = inlined_call_operand.hbm [shape: f32[256,256], index: 7, kind: output, shape index: {}]  }
   0x1   :  { %v62_v0 = vld [vmem:[%s2086_s1 + $0x18] sm:$0xff]  ;;  %v61_v1 = vld [vmem:[%s2086_s1 + $0x10] sm:$0xff]  ;;  %v60_v2 = vld [vmem:[%s2086_s1 + $0x8] sm:$0xff] }
   0x2   :  { %176 = vmatpush.msra.mxu0 %v62_v0  ;;  %1268 = vmatpush.msra.mxu3 %v62_v0  ;;  %v59_v3 = vld [vmem:[%s2086_s1] sm:$0xff] }
   0x4   :  { %177 = vmatpush.msra.mxu0 %v61_v1  ;;  %1269 = vmatpush.msra.mxu3 %v61_v1 }
   0x5   :  { %12 = vsyncpa [#allocation3], 0  ;;  %v27_v4 = vld [vmem:[%s2085_s0] sm:$0xff]  ;;  %vm67_vm0 = vcmask 261120   ;;  %v28_v5 = vld [vmem:[%s2085_s0 + $0x8] sm:$0xff]  ;;  %s1224_s18 = sshll.u32 %s2092_s7, 4  ;;  %s1225_s18 = int_to_ptr.hbm [resolvable:$true] %s1224_s18 }
   0x6   :  { %178 = vmatpush.msra.mxu0 %v60_v2  ;;  %1270 = vmatpush.msra.mxu3 %v60_v2  ;;  %v29_v6 = vld [vmem:[%s2085_s0 + $0x10] sm:$0xff]  ;;  %v30_v7 = vld [vmem:[%s2085_s0 + $0x18] sm:$0xff]  ;;  %v31_v8 = vld [vmem:[%s2085_s0 + $0x20] sm:$0xff]  ;;  %s1466_s19 = smov 256   ;;  %s1467_s20 = smov 16  }
   0x7   :  { %v32_v9 = vld [vmem:[%s2085_s0 + $0x28] sm:$0xff]  ;;  %v33_v10 = vld [vmem:[%s2085_s0 + $0x30] sm:$0xff]  ;;  %v34_v11 = vld [vmem:[%s2085_s0 + $0x38] sm:$0xff] }
   0x8   :  { %179 = vmatpush.msra.mxu0 %v59_v3  ;;  %1271 = vmatpush.msra.mxu3 %v59_v3  ;;  %v35_v12 = vld [vmem:[%s2085_s0 + $0x40] sm:$0xff]  ;;  %v324_v13 = vld [vmem:[%s2088_s3 + $0x78] sm:$0xff]  ;;  %v323_v14 = vld [vmem:[%s2088_s3 + $0x70] sm:$0xff] }
   0x9   :  { %1236 = vmatmul.msk.f32.vlgmr.msra.gmra.mxu0 %vm67_vm0, %v27_v4  ;;  %329 = vmatpush.msra.mxu1 %v324_v13  ;;  %v322_v15 = vld [vmem:[%s2088_s3 + $0x68] sm:$0xff]  ;;  %v321_v17 = vld [vmem:[%s2088_s3 + $0x60] sm:$0xff]  ;;  %v320_v18 = vld [vmem:[%s2088_s3 + $0x58] sm:$0xff] }
   0xa   :  { %1272 = vmatpush.msrb.mxu3 %v324_v13  ;;  %v36_v16 = vld [vmem:[%s2085_s0 + $0x48] sm:$0xff]  ;;  %v319_v19 = vld [vmem:[%s2088_s3 + $0x50] sm:$0xff]  ;;  %v317_v22 = vld [vmem:[%s2088_s3 + $0x40] sm:$0xff] }
   0xb   :  { %330 = vmatpush.msra.mxu1 %v323_v14  ;;  %v318_v20 = vld [vmem:[%s2088_s3 + $0x48] sm:$0xff]  ;;  %v37_v21 = vld [vmem:[%s2085_s0 + $0x50] sm:$0xff]  ;;  %v316_v23 = vld [vmem:[%s2088_s3 + $0x38] sm:$0xff] }
   0xc   :  { %1273 = vmatpush.msrb.mxu3 %v323_v14  ;;  %v315_v24 = vld [vmem:[%s2088_s3 + $0x30] sm:$0xff]  ;;  %v314_v25 = vld [vmem:[%s2088_s3 + $0x28] sm:$0xff]  ;;  %v38_v26 = vld [vmem:[%s2085_s0 + $0x58] sm:$0xff] }
   0xd   :  { %331 = vmatpush.msra.mxu1 %v322_v15  ;;  %v313_v27 = vld [vmem:[%s2088_s3 + $0x20] sm:$0xff]  ;;  %v312_v28 = vld [vmem:[%s2088_s3 + $0x18] sm:$0xff]  ;;  %v311_v29 = vld [vmem:[%s2088_s3 + $0x10] sm:$0xff] }
   0xe   :  { %1274 = vmatpush.msrb.mxu3 %v322_v15  ;;  %v39_v30 = vld [vmem:[%s2085_s0 + $0x60] sm:$0xff]  ;;  %v310_v31 = vld [vmem:[%s2088_s3 + $0x8] sm:$0xff]  ;;  %v41_v34 = vld [vmem:[%s2085_s0 + $0x70] sm:$0xff] }
   0xf   :  { %332 = vmatpush.msra.mxu1 %v321_v17  ;;  %v309_v32 = vld [vmem:[%s2088_s3] sm:$0xff]  ;;  %v40_v33 = vld [vmem:[%s2085_s0 + $0x68] sm:$0xff]  ;;  %v42_v35 = vld [vmem:[%s2085_s0 + $0x78] sm:$0xff] }
  0x10   :  { %1275 = vmatpush.msrb.mxu3 %v321_v17  ;;  %v1635_v36 = vld [vmem:[%s2087_s2] ss:$0 sm:$0xff]  ;;  %v44_v42 = vld [vmem:[%s2085_s0 + $0x88] sm:$0xff]  ;;  %v45_v46 = vld [vmem:[%s2085_s0 + $0x90] sm:$0xff] }
  0x11   :  { %1237 = vmatmul.msk.f32.gmra.mxu0 %vm67_vm0, %v28_v5  ;;  %333 = vmatpush.msra.mxu1 %v320_v18  ;;  %v43_v38 = vld [vmem:[%s2085_s0 + $0x80] sm:$0xff]  ;;  %v46_v50 = vld [vmem:[%s2085_s0 + $0x98] sm:$0xff]  ;;  %v48_v58 = vld [vmem:[%s2085_s0 + $0xa8] sm:$0xff] }
  0x12   :  { %1276 = vmatpush.msrb.mxu3 %v320_v18  ;;  %v47_v54 = vld [vmem:[%s2085_s0 + $0xa0] sm:$0xff]  ;;  %v53_v61 = vld [vmem:[%s2085_s0 + $0xd0] sm:$0xff]  ;;  %v54_v2 = vld [vmem:[%s2085_s0 + $0xd8] sm:$0xff] }
  0x13   :  { %334 = vmatpush.msra.mxu1 %v319_v19  ;;  %1262 = vmatmul.msk.f32.vlgmr.msra.gmra.mxu3 %vm67_vm0, %v53_v61  ;;  %v49_v63 = vld [vmem:[%s2085_s0 + $0xb0] sm:$0xff]  ;;  %v50_v4 = vld [vmem:[%s2085_s0 + $0xb8] sm:$0xff]  ;;  %v52_v15 = vld [vmem:[%s2085_s0 + $0xc8] sm:$0xff] }
  0x14   :  { %1277 = vmatpush.msrb.mxu3 %v319_v19  ;;  %v489_v13 = vld [vmem:[%s2090_s5 + $0x78] sm:$0xff]  ;;  %v488_v17 = vld [vmem:[%s2090_s5 + $0x70] sm:$0xff]  ;;  %v487_v19 = vld [vmem:[%s2090_s5 + $0x68] sm:$0xff] }
  0x15   :  { %335 = vmatpush.msra.mxu1 %v318_v20  ;;  %494 = vmatpush.msra.mxu2 %v489_v13 }
  0x16   :  { %1278 = vmatpush.msrb.mxu3 %v318_v20  ;;  %v57_v20 = vld [vmem:[%s2085_s0 + $0xf0] sm:$0xff] }
  0x17   :  { %336 = vmatpush.msra.mxu1 %v317_v22  ;;  %495 = vmatpush.msra.mxu2 %v488_v17 }
  0x18   :  { %1279 = vmatpush.msrb.mxu3 %v317_v22  ;;  %v485_v22 = vld [vmem:[%s2090_s5 + $0x58] sm:$0xff] }
  0x19   :  { %1238 = vmatmul.msk.f32.gmra.mxu0 %vm67_vm0, %v29_v6  ;;  %337 = vmatpush.msra.mxu1 %v316_v23 }
  0x1a   :  { %1280 = vmatpush.msrb.mxu3 %v316_v23  ;;  %496 = vmatpush.msra.mxu2 %v487_v19 }
  0x1b   :  { %338 = vmatpush.msra.mxu1 %v315_v24  ;;  %1263 = vmatmul.msk.f32.gmra.mxu3 %vm67_vm0, %v54_v2 }
  0x1c   :  { %1281 = vmatpush.msrb.mxu3 %v315_v24 }
  0x1d   :  { %339 = vmatpush.msra.mxu1 %v314_v25 }
  0x1e   :  { %1282 = vmatpush.msrb.mxu3 %v314_v25  ;;  %v484_v25 = vld [vmem:[%s2090_s5 + $0x50] sm:$0xff] }
  0x1f   :  { %340 = vmatpush.msra.mxu1 %v313_v27 }
  0x20   :  { %1283 = vmatpush.msrb.mxu3 %v313_v27  ;;  %v483_v27 = vld [vmem:[%s2090_s5 + $0x48] sm:$0xff] }
  0x21   :  { %1239 = vmatmul.msk.f32.gmra.mxu0 %vm67_vm0, %v30_v7  ;;  %341 = vmatpush.msra.mxu1 %v312_v28  ;;  %v55_v7 = vld [vmem:[%s2085_s0 + $0xe0] sm:$0xff] }
  0x22   :  { %1284 = vmatpush.msrb.mxu3 %v312_v28  ;;  %v58_v28 = vld [vmem:[%s2085_s0 + $0xf8] sm:$0xff] }
  0x23   :  { %342 = vmatpush.msra.mxu1 %v311_v29  ;;  %1264 = vmatmul.msk.f32.gmra.mxu3 %vm67_vm0, %v55_v7 }
  0x24   :  { %1285 = vmatpush.msrb.mxu3 %v311_v29  ;;  %v482_v29 = vld [vmem:[%s2090_s5 + $0x40] sm:$0xff] }
  0x25   :  { %343 = vmatpush.msra.mxu1 %v310_v31 }
  0x26   :  { %1286 = vmatpush.msrb.mxu3 %v310_v31 }
  0x27   :  { %344 = vmatpush.msra.mxu1 %v309_v32 }
  0x28   :  { %1287 = vmatpush.msrb.mxu3 %v309_v32 }
  0x29   :  { %1240 = vmatmul.msk.f32.gmra.mxu0 %vm67_vm0, %v31_v8 }
  0x2a   :  { %1288 = vmatpush.msra.mxu3 %v489_v13 }
  0x2c   :  { %1289 = vmatpush.msra.mxu3 %v488_v17 }
  0x2e   :  { %1290 = vmatpush.msra.mxu3 %v487_v19 }
  0x31   :  { %1241 = vmatmul.msk.f32.gmra.mxu0 %vm67_vm0, %v32_v9  ;;  %v51_v9 = vld [vmem:[%s2085_s0 + $0xc0] sm:$0xff] }
  0x39   :  { %1242 = vmatmul.msk.f32.gmra.mxu0 %vm67_vm0, %v33_v10 }
  0x41   :  { %1243 = vmatmul.msk.f32.gmra.mxu0 %vm67_vm0, %v34_v11 }
  0x49   :  { %1244 = vmatmul.msk.f32.gmra.mxu0 %vm67_vm0, %v35_v12  ;;  %v56_v12 = vld [vmem:[%s2085_s0 + $0xe8] sm:$0xff] }
  0x4a   :  { %1265 = vmatmul.msk.f32.gmra.mxu3 %vm67_vm0, %v56_v12 }
  0x51   :  { %1245 = vmatmul.msk.f32.gmra.mxu0 %vm67_vm0, %v36_v16 }
  0x52   :  { %1266 = vmatmul.msk.f32.gmra.mxu3 %vm67_vm0, %v57_v20 }
  0x59   :  { %1246 = vmatmul.msk.f32.gmra.mxu0 %vm67_vm0, %v37_v21  ;;  %v486_v21 = vld [vmem:[%s2090_s5 + $0x60] sm:$0xff] }
  0x5a   :  { %497 = vmatpush.msra.mxu2 %v486_v21  ;;  %1291 = vmatpush.msra.mxu3 %v486_v21 }
  0x5b   :  { %1267 = vmatmul.msk.f32.gmra.mxu3 %vm67_vm0, %v58_v28 }
  0x5c   :  { %498 = vmatpush.msra.mxu2 %v485_v22  ;;  %1292 = vmatpush.msra.mxu3 %v485_v22 }
  0x5e   :  { %499 = vmatpush.msra.mxu2 %v484_v25  ;;  %1293 = vmatpush.msra.mxu3 %v484_v25 }
  0x60   :  { %500 = vmatpush.msra.mxu2 %v483_v27  ;;  %1294 = vmatpush.msra.mxu3 %v483_v27 }
  0x61   :  { %1247 = vmatmul.msk.f32.gmra.mxu0 %vm67_vm0, %v38_v26 }
  0x62   :  { %501 = vmatpush.msra.mxu2 %v482_v29  ;;  %1295 = vmatpush.msra.mxu3 %v482_v29 }
  0x69   :  { %1248 = vmatmul.msk.f32.gmra.mxu0 %vm67_vm0, %v39_v30  ;;  %v481_v30 = vld [vmem:[%s2090_s5 + $0x38] sm:$0xff] }
  0x6a   :  { %502 = vmatpush.msra.mxu2 %v481_v30  ;;  %1296 = vmatpush.msra.mxu3 %v481_v30 }
  0x71   :  { %1249 = vmatmul.msk.f32.gmra.mxu0 %vm67_vm0, %v40_v33  ;;  %v480_v33 = vld [vmem:[%s2090_s5 + $0x30] sm:$0xff] }
  0x72   :  { %503 = vmatpush.msra.mxu2 %v480_v33  ;;  %1297 = vmatpush.msra.mxu3 %v480_v33 }
  0x79   :  { %1250 = vmatmul.msk.f32.gmra.mxu0 %vm67_vm0, %v41_v34 }
  0x81   :  { %1251 = vmatmul.msk.f32.gmra.mxu0 %vm67_vm0, %v42_v35  ;;  %v479_v35 = vld [vmem:[%s2090_s5 + $0x28] sm:$0xff] }
  0x82   :  { %504 = vmatpush.msra.mxu2 %v479_v35  ;;  %1298 = vmatpush.msra.mxu3 %v479_v35 }
  0x86   :  { %v181_v37 = vpop.f32.mrf.mxu0 }
  0x87   :  { %v182_v39 = vadd.f32 %v1635_v36, %v181_v37  ;;  %v478_v37 = vld [vmem:[%s2090_s5 + $0x20] sm:$0xff] }
  0x88   :  { %505 = vmatpush.msra.mxu2 %v478_v37  ;;  %1299 = vmatpush.msra.mxu3 %v478_v37 }
  0x89   :  { %1252 = vmatmul.msk.f32.gmra.mxu0 %vm67_vm0, %v43_v38  ;;  %v277_v40 = vmax.f32 %v182_v39, 0.0  ;;  %v477_v38 = vld [vmem:[%s2090_s5 + $0x18] sm:$0xff] }
  0x8a   :  { %506 = vmatpush.msra.mxu2 %v477_v38  ;;  %1300 = vmatpush.msra.mxu3 %v477_v38 }
  0x8b   :  { %345 = vmatmul.f32.vlgmr.msra.gmra.mxu1 %v277_v40 }
  0x8e   :  { %v184_v41 = vpop.f32.mrf.mxu0 }
  0x8f   :  { %v185_v43 = vadd.f32 %v1635_v36, %v184_v41  ;;  %v476_v41 = vld [vmem:[%s2090_s5 + $0x10] sm:$0xff] }
  0x90   :  { %507 = vmatpush.msra.mxu2 %v476_v41  ;;  %1301 = vmatpush.msra.mxu3 %v476_v41 }
  0x91   :  { %1253 = vmatmul.msk.f32.gmra.mxu0 %vm67_vm0, %v44_v42  ;;  %v278_v44 = vmax.f32 %v185_v43, 0.0  ;;  %v475_v43 = vld [vmem:[%s2090_s5 + $0x8] sm:$0xff] }
  0x92   :  { %508 = vmatpush.msra.mxu2 %v475_v43  ;;  %1302 = vmatpush.msra.mxu3 %v475_v43 }
  0x93   :  { %348 = vmatmul.f32.gmra.mxu1 %v278_v44  ;;  %v474_v44 = vld [vmem:[%s2090_s5] sm:$0xff] }
  0x94   :  { %509 = vmatpush.msra.mxu2 %v474_v44  ;;  %1303 = vmatpush.msra.mxu3 %v474_v44 }
  0x96   :  { %v187_v45 = vpop.f32.mrf.mxu0  ;;  %v259_v41 = vpop.f32.mrf.mxu3 }
  0x97   :  { %v188_v47 = vadd.f32 %v1635_v36, %v187_v45 }
  0x99   :  { %v279_v48 = vmax.f32 %v188_v47, 0.0  ;;  %1254 = vmatmul.msk.f32.gmra.mxu0 %vm67_vm0, %v45_v46 }
  0x9b   :  { %351 = vmatmul.f32.gmra.mxu1 %v279_v48 }
  0x9e   :  { %v190_v49 = vpop.f32.mrf.mxu0 }
  0x9f   :  { %v191_v51 = vadd.f32 %v1635_v36, %v190_v49 }
  0xa1   :  { %v280_v52 = vmax.f32 %v191_v51, 0.0  ;;  %1255 = vmatmul.msk.f32.gmra.mxu0 %vm67_vm0, %v46_v50 }
  0xa3   :  { %354 = vmatmul.f32.gmra.mxu1 %v280_v52 }
  0xa6   :  { %v193_v53 = vpop.f32.mrf.mxu0 }
  0xa7   :  { %v194_v55 = vadd.f32 %v1635_v36, %v193_v53 }
  0xa9   :  { %v281_v56 = vmax.f32 %v194_v55, 0.0  ;;  %1256 = vmatmul.msk.f32.gmra.mxu0 %vm67_vm0, %v47_v54  ;;  %v1768_v54 = vld [vmem:[%s2089_s4] ss:$0 sm:$0xff] }
  0xab   :  { %357 = vmatmul.f32.gmra.mxu1 %v281_v56 }
  0xae   :  { %v196_v57 = vpop.f32.mrf.mxu0 }
  0xaf   :  { %v197_v59 = vadd.f32 %v1635_v36, %v196_v57 }
  0xb1   :  { %v282_v60 = vmax.f32 %v197_v59, 0.0  ;;  %1257 = vmatmul.msk.f32.gmra.mxu0 %vm67_vm0, %v48_v58 }
  0xb3   :  { %360 = vmatmul.f32.gmra.mxu1 %v282_v60 }
  0xb6   :  { %v199_v62 = vpop.f32.mrf.mxu0 }
  0xb7   :  { %v200_v0 = vadd.f32 %v1635_v36, %v199_v62 }
  0xb9   :  { %v283_v1 = vmax.f32 %v200_v0, 0.0  ;;  %1258 = vmatmul.msk.f32.gmra.mxu0 %vm67_vm0, %v49_v63 }
  0xbb   :  { %363 = vmatmul.f32.gmra.mxu1 %v283_v1 }
  0xbe   :  { %v202_v3 = vpop.f32.mrf.mxu0 }
  0xbf   :  { %v203_v5 = vadd.f32 %v1635_v36, %v202_v3 }
  0xc1   :  { %v284_v6 = vmax.f32 %v203_v5, 0.0  ;;  %1259 = vmatmul.msk.f32.gmra.mxu0 %vm67_vm0, %v50_v4 }
  0xc3   :  { %366 = vmatmul.f32.gmra.mxu1 %v284_v6 }
  0xc6   :  { %v205_v8 = vpop.f32.mrf.mxu0 }
  0xc7   :  { %v206_v10 = vadd.f32 %v1635_v36, %v205_v8 }
  0xc9   :  { %v285_v11 = vmax.f32 %v206_v10, 0.0  ;;  %1260 = vmatmul.msk.f32.gmra.mxu0 %vm67_vm0, %v51_v9 }
  0xcb   :  { %369 = vmatmul.f32.gmra.mxu1 %v285_v11 }
  0xce   :  { %v208_v14 = vpop.f32.mrf.mxu0 }
  0xcf   :  { %v209_v16 = vadd.f32 %v1635_v36, %v208_v14 }
  0xd1   :  { %v286_v18 = vmax.f32 %v209_v16, 0.0  ;;  %1261 = vmatmul.msk.f32.gmra.mxu0 %vm67_vm0, %v52_v15 }
  0xd3   :  { %372 = vmatmul.f32.gmra.mxu1 %v286_v18 }
  0xd6   :  { %v211_v23 = vpop.f32.mrf.mxu0 }
  0xd7   :  { %v212_v24 = vadd.f32 %v1635_v36, %v211_v23 }
  0xd9   :  { %v287_v26 = vmax.f32 %v212_v24, 0.0 }
  0xdb   :  { %375 = vmatmul.f32.gmra.mxu1 %v287_v26 }
  0xde   :  { %v214_v31 = vpop.f32.mrf.mxu0 }
  0xdf   :  { %v215_v32 = vadd.f32 %v1635_v36, %v214_v31 }
  0xe1   :  { %v288_v34 = vmax.f32 %v215_v32, 0.0 }
  0xe3   :  { %378 = vmatmul.f32.gmra.mxu1 %v288_v34 }
  0xe6   :  { %v217_v39 = vpop.f32.mrf.mxu0 }
  0xe7   :  { %v218_v40 = vadd.f32 %v1635_v36, %v217_v39 }
  0xe9   :  { %v289_v42 = vmax.f32 %v218_v40, 0.0 }
  0xeb   :  { %381 = vmatmul.f32.gmra.mxu1 %v289_v42 }
  0xee   :  { %v220_v45 = vpop.f32.mrf.mxu0 }
  0xef   :  { %v221_v46 = vadd.f32 %v1635_v36, %v220_v45 }
  0xf1   :  { %v290_v47 = vmax.f32 %v221_v46, 0.0 }
  0xf3   :  { %384 = vmatmul.f32.gmra.mxu1 %v290_v47 }
  0xf6   :  { %v223_v48 = vpop.f32.mrf.mxu0 }
  0xf7   :  { %v224_v49 = vadd.f32 %v1635_v36, %v223_v48 }
  0xf9   :  { %v291_v50 = vmax.f32 %v224_v49, 0.0 }
  0xfb   :  { %387 = vmatmul.f32.gmra.mxu1 %v291_v50  ;;  %v262_v50 = vpop.f32.mrf.mxu3 }
  0xfe   :  { %v226_v51 = vpop.f32.mrf.mxu0 }
  0xff   :  { %v227_v52 = vadd.f32 %v1635_v36, %v226_v51 }
 0x101   :  { %v292_v53 = vmax.f32 %v227_v52, 0.0 }
 0x103   :  { %390 = vmatmul.f32.gmra.mxu1 %v292_v53 }
 0x106   :  { %v229_v55 = vpop.f32.mrf.mxu0 }
 0x107   :  { %v230_v56 = vadd.f32 %v1635_v36, %v229_v55  ;;  %v260_v55 = vadd.f32 %v1635_v36, %v259_v41 }
 0x108   :  { %v346_v57 = vpop.f32.mrf.mxu1 }
 0x109   :  { %v293_v58 = vmax.f32 %v230_v56, 0.0  ;;  %v347_v59 = vadd.f32 %v1768_v54, %v346_v57  ;;  %v303_v56 = vmax.f32 %v260_v55, 0.0 }
 0x10b   :  { %v442_v60 = vmax.f32 %v347_v59, 0.0  ;;  %393 = vmatmul.f32.gmra.mxu1 %v293_v58  ;;  %v265_v59 = vpop.f32.mrf.mxu3 }
 0x10d   :  { %1154 = vst [vmem:[#allocation2] sm:$0xff] %v442_v60  ;;  %510 = vmatmul.f32.vlgmr.msra.gmra.mxu2 %v442_v60 }
 0x10e   :  { %v232_v61 = vpop.f32.mrf.mxu0 }
 0x10f   :  { %v233_v62 = vadd.f32 %v1635_v36, %v232_v61  ;;  %v263_v61 = vadd.f32 %v1635_v36, %v262_v50 }
 0x110   :  { %v349_v63 = vpop.f32.mrf.mxu1 }
 0x111   :  { %v294_v0 = vmax.f32 %v233_v62, 0.0  ;;  %v350_v1 = vadd.f32 %v1768_v54, %v349_v63  ;;  %v304_v62 = vmax.f32 %v263_v61, 0.0 }
 0x113   :  { %v443_v2 = vmax.f32 %v350_v1, 0.0  ;;  %396 = vmatmul.f32.gmra.mxu1 %v294_v0 }
 0x115   :  { %1155 = vst [vmem:[#allocation2 + $0x10] sm:$0xff] %v443_v2  ;;  %513 = vmatmul.f32.gmra.mxu2 %v443_v2  ;;  %v266_v2 = vadd.f32 %v1635_v36, %v265_v59 }
 0x116   :  { %v235_v3 = vpop.f32.mrf.mxu0 }
 0x117   :  { %v236_v4 = vadd.f32 %v1635_v36, %v235_v3  ;;  %v268_v3 = vpop.f32.mrf.mxu3 }
 0x118   :  { %v352_v5 = vpop.f32.mrf.mxu1 }
 0x119   :  { %v295_v6 = vmax.f32 %v236_v4, 0.0  ;;  %v353_v7 = vadd.f32 %v1768_v54, %v352_v5  ;;  %v305_v4 = vmax.f32 %v266_v2, 0.0 }
 0x11b   :  { %v444_v8 = vmax.f32 %v353_v7, 0.0  ;;  %399 = vmatmul.f32.gmra.mxu1 %v295_v6 }
 0x11d   :  { %1156 = vst [vmem:[#allocation2 + $0x20] sm:$0xff] %v444_v8  ;;  %516 = vmatmul.f32.gmra.mxu2 %v444_v8  ;;  %v269_v8 = vadd.f32 %v1635_v36, %v268_v3 }
 0x11e   :  { %v238_v9 = vpop.f32.mrf.mxu0 }
 0x11f   :  { %v239_v10 = vadd.f32 %v1635_v36, %v238_v9  ;;  %v271_v9 = vpop.f32.mrf.mxu3 }
 0x120   :  { %v355_v11 = vpop.f32.mrf.mxu1 }
 0x121   :  { %v296_v12 = vmax.f32 %v239_v10, 0.0  ;;  %v356_v13 = vadd.f32 %v1768_v54, %v355_v11  ;;  %v306_v10 = vmax.f32 %v269_v8, 0.0 }
 0x123   :  { %v445_v14 = vmax.f32 %v356_v13, 0.0  ;;  %402 = vmatmul.f32.gmra.mxu1 %v296_v12 }
 0x125   :  { %1157 = vst [vmem:[#allocation2 + $0x30] sm:$0xff] %v445_v14  ;;  %519 = vmatmul.f32.gmra.mxu2 %v445_v14  ;;  %v272_v14 = vadd.f32 %v1635_v36, %v271_v9 }
 0x126   :  { %v241_v15 = vpop.f32.mrf.mxu0 }
 0x127   :  { %v242_v16 = vadd.f32 %v1635_v36, %v241_v15  ;;  %v307_v15 = vmax.f32 %v272_v14, 0.0 }
 0x128   :  { %v358_v17 = vpop.f32.mrf.mxu1 }
 0x129   :  { %v297_v18 = vmax.f32 %v242_v16, 0.0  ;;  %v359_v19 = vadd.f32 %v1768_v54, %v358_v17  ;;  %v274_v17 = vpop.f32.mrf.mxu3 }
 0x12b   :  { %v446_v20 = vmax.f32 %v359_v19, 0.0  ;;  %405 = vmatmul.f32.gmra.mxu1 %v297_v18 }
 0x12d   :  { %1158 = vst [vmem:[#allocation2 + $0x40] sm:$0xff] %v446_v20  ;;  %522 = vmatmul.f32.gmra.mxu2 %v446_v20  ;;  %v275_v20 = vadd.f32 %v1635_v36, %v274_v17 }
 0x12e   :  { %v244_v21 = vpop.f32.mrf.mxu0 }
 0x12f   :  { %v245_v22 = vadd.f32 %v1635_v36, %v244_v21  ;;  %v308_v21 = vmax.f32 %v275_v20, 0.0 }
 0x130   :  { %v361_v23 = vpop.f32.mrf.mxu1 }
 0x131   :  { %v298_v24 = vmax.f32 %v245_v22, 0.0  ;;  %v362_v25 = vadd.f32 %v1768_v54, %v361_v23 }
 0x133   :  { %v447_v26 = vmax.f32 %v362_v25, 0.0  ;;  %408 = vmatmul.f32.gmra.mxu1 %v298_v24 }
 0x135   :  { %1159 = vst [vmem:[#allocation2 + $0x50] sm:$0xff] %v447_v26  ;;  %525 = vmatmul.f32.gmra.mxu2 %v447_v26 }
 0x136   :  { %v247_v27 = vpop.f32.mrf.mxu0 }
 0x137   :  { %v248_v28 = vadd.f32 %v1635_v36, %v247_v27 }
 0x138   :  { %v364_v29 = vpop.f32.mrf.mxu1 }
 0x139   :  { %v299_v30 = vmax.f32 %v248_v28, 0.0  ;;  %v365_v31 = vadd.f32 %v1768_v54, %v364_v29 }
 0x13b   :  { %v448_v32 = vmax.f32 %v365_v31, 0.0  ;;  %411 = vmatmul.f32.gmra.mxu1 %v299_v30 }
 0x13d   :  { %1160 = vst [vmem:[#allocation2 + $0x60] sm:$0xff] %v448_v32  ;;  %528 = vmatmul.f32.gmra.mxu2 %v448_v32 }
 0x13e   :  { %v250_v33 = vpop.f32.mrf.mxu0 }
 0x13f   :  { %v251_v34 = vadd.f32 %v1635_v36, %v250_v33 }
 0x140   :  { %v367_v35 = vpop.f32.mrf.mxu1 }
 0x141   :  { %v300_v37 = vmax.f32 %v251_v34, 0.0  ;;  %v368_v38 = vadd.f32 %v1768_v54, %v367_v35 }
 0x143   :  { %v449_v39 = vmax.f32 %v368_v38, 0.0  ;;  %414 = vmatmul.f32.gmra.mxu1 %v300_v37 }
 0x145   :  { %1161 = vst [vmem:[#allocation2 + $0x70] sm:$0xff] %v449_v39  ;;  %531 = vmatmul.f32.gmra.mxu2 %v449_v39 }
 0x146   :  { %v253_v40 = vpop.f32.mrf.mxu0 }
 0x147   :  { %v254_v42 = vadd.f32 %v1635_v36, %v253_v40 }
 0x148   :  { %v370_v43 = vpop.f32.mrf.mxu1 }
 0x149   :  { %v301_v44 = vmax.f32 %v254_v42, 0.0  ;;  %v371_v45 = vadd.f32 %v1768_v54, %v370_v43 }
 0x14b   :  { %v450_v46 = vmax.f32 %v371_v45, 0.0  ;;  %417 = vmatmul.f32.vlgmr.msrb.gmra.mxu3 %v301_v44 }
 0x14d   :  { %1162 = vst [vmem:[#allocation2 + $0x80] sm:$0xff] %v450_v46  ;;  %534 = vmatmul.f32.gmra.mxu2 %v450_v46 }
 0x14e   :  { %v256_v47 = vpop.f32.mrf.mxu0 }
 0x14f   :  { %v257_v48 = vadd.f32 %v1635_v36, %v256_v47  ;;  %v1806_v36 = vld [vmem:[%s2091_s6] ss:$0 sm:$0xff] }
 0x150   :  { %v373_v49 = vpop.f32.mrf.mxu1 }
 0x151   :  { %v302_v51 = vmax.f32 %v257_v48, 0.0  ;;  %v374_v52 = vadd.f32 %v1768_v54, %v373_v49 }
 0x153   :  { %v451_v53 = vmax.f32 %v374_v52, 0.0  ;;  %420 = vmatmul.f32.gmra.mxu3 %v302_v51 }
 0x155   :  { %1163 = vst [vmem:[#allocation2 + $0x90] sm:$0xff] %v451_v53  ;;  %537 = vmatmul.f32.gmra.mxu2 %v451_v53 }
 0x158   :  { %v376_v57 = vpop.f32.mrf.mxu1 }
 0x159   :  { %v377_v58 = vadd.f32 %v1768_v54, %v376_v57 }
 0x15b   :  { %v452_v60 = vmax.f32 %v377_v58, 0.0  ;;  %423 = vmatmul.f32.gmra.mxu3 %v303_v56  ;;  %v1119_v56 = vlaneseq }
 0x15d   :  { %1164 = vst [vmem:[#allocation2 + $0xa0] sm:$0xff] %v452_v60  ;;  %540 = vmatmul.f32.gmra.mxu2 %v452_v60 }
 0x160   :  { %v379_v63 = vpop.f32.mrf.mxu1 }
 0x161   :  { %v380_v0 = vadd.f32 %v1768_v54, %v379_v63  ;;  %v1823_v63 = vand.u32 127, %v1119_v56 }
 0x163   :  { %v453_v1 = vmax.f32 %v380_v0, 0.0  ;;  %426 = vmatmul.f32.gmra.mxu3 %v304_v62  ;;  %vm1121_vm2 = vcmp.ge.s32.totalorder %v1823_v63, 16 }
 0x165   :  { %1165 = vst [vmem:[#allocation2 + $0xb0] sm:$0xff] %v453_v1  ;;  %543 = vmatmul.f32.gmra.mxu2 %v453_v1 }
 0x168   :  { %v382_v5 = vpop.f32.mrf.mxu1 }
 0x169   :  { %v383_v6 = vadd.f32 %v1768_v54, %v382_v5 }
 0x16b   :  { %v454_v7 = vmax.f32 %v383_v6, 0.0  ;;  %429 = vmatmul.f32.gmra.mxu3 %v305_v4 }
 0x16d   :  { %1166 = vst [vmem:[#allocation2 + $0xc0] sm:$0xff] %v454_v7  ;;  %546 = vmatmul.f32.gmra.mxu2 %v454_v7 }
 0x170   :  { %v385_v11 = vpop.f32.mrf.mxu1 }
 0x171   :  { %v386_v12 = vadd.f32 %v1768_v54, %v385_v11 }
 0x173   :  { %v455_v13 = vmax.f32 %v386_v12, 0.0  ;;  %432 = vmatmul.f32.gmra.mxu3 %v306_v10 }
 0x175   :  { %1167 = vst [vmem:[#allocation2 + $0xd0] sm:$0xff] %v455_v13  ;;  %549 = vmatmul.f32.gmra.mxu2 %v455_v13 }
 0x178   :  { %v388_v16 = vpop.f32.mrf.mxu1 }
 0x179   :  { %v389_v18 = vadd.f32 %v1768_v54, %v388_v16 }
 0x17b   :  { %v456_v19 = vmax.f32 %v389_v18, 0.0  ;;  %435 = vmatmul.f32.gmra.mxu3 %v307_v15 }
 0x17d   :  { %1168 = vst [vmem:[#allocation2 + $0xe0] sm:$0xff] %v456_v19  ;;  %552 = vmatmul.f32.gmra.mxu2 %v456_v19 }
 0x180   :  { %v391_v22 = vpop.f32.mrf.mxu1 }
 0x181   :  { %v392_v23 = vadd.f32 %v1768_v54, %v391_v22 }
 0x183   :  { %v457_v24 = vmax.f32 %v392_v23, 0.0  ;;  %438 = vmatmul.f32.gmra.mxu3 %v308_v21 }
 0x185   :  { %1169 = vst [vmem:[#allocation2 + $0xf0] sm:$0xff] %v457_v24  ;;  %555 = vmatmul.f32.gmra.mxu2 %v457_v24 }
 0x188   :  { %v394_v25 = vpop.f32.mrf.mxu1 }
 0x189   :  { %v395_v26 = vadd.f32 %v1768_v54, %v394_v25 }
 0x18b   :  { %v458_v27 = vmax.f32 %v395_v26, 0.0 }
 0x18d   :  { %1170 = vst [vmem:[#allocation2 + $0x100] sm:$0xff] %v458_v27  ;;  %558 = vmatmul.f32.gmra.mxu2 %v458_v27 }
 0x190   :  { %v397_v28 = vpop.f32.mrf.mxu1  ;;  %v511_v29 = vpop.f32.mrf.mxu2 }
 0x191   :  { %v398_v30 = vadd.f32 %v1768_v54, %v397_v28  ;;  %v1810_v31 = vadd.f32 %v1806_v36, %v511_v29 }
 0x193   :  { %v459_v32 = vmax.f32 %v398_v30, 0.0  ;;  %v639_v33 = vand.u32 2147483647, %v1810_v31  ;;  %v607_v7 = vmax.f32 %v1810_v31, 0.0 }
 0x195   :  { %1171 = vst [vmem:[#allocation2 + $0x110] sm:$0xff] %v459_v32  ;;  %v671_v34 = vsub.f32 0.0, %v639_v33  ;;  %561 = vmatmul.f32.gmra.mxu2 %v459_v32 }
 0x197   :  { %v703_v35 = vmul.f32 1.442695, %v671_v34 }
 0x198   :  { %v400_v37 = vpop.f32.mrf.mxu1  ;;  %v514_v38 = vpop.f32.mrf.mxu2 }
 0x199   :  { %1310 = vpow2.f32 %v703_v35  ;;  %v401_v39 = vadd.f32 %v1768_v54, %v400_v37  ;;  %v1815_v40 = vadd.f32 %v1806_v36, %v514_v38 }
 0x19b   :  { %v460_v41 = vmax.f32 %v401_v39, 0.0  ;;  %v640_v42 = vand.u32 2147483647, %v1815_v40  ;;  %v608_v28 = vmax.f32 %v1815_v40, 0.0 }
 0x19d   :  { %1172 = vst [vmem:[#allocation2 + $0x120] sm:$0xff] %v460_v41  ;;  %v672_v43 = vsub.f32 0.0, %v640_v42  ;;  %564 = vmatmul.f32.gmra.mxu2 %v460_v41 }
 0x19f   :  { %v1311_v44 = vpop.eup %1310  ;;  %v705_v45 = vmul.f32 1.442695, %v672_v43 }
 0x1a0   :  { %v767_v46 = vadd.f32 1.0, %v1311_v44  ;;  %v770_v47 = vmul.f32 -0.5, %v1311_v44  ;;  %v403_v48 = vpop.f32.mrf.mxu1  ;;  %v517_v49 = vpop.f32.mrf.mxu2  ;;  %v773_v58 = vand.u32 2147483647, %v1311_v44 }
 0x1a1   :  { %1312 = vpow2.f32 %v705_v45  ;;  %v404_v50 = vadd.f32 %v1768_v54, %v403_v48  ;;  %v1820_v51 = vadd.f32 %v1806_v36, %v517_v49 }
 0x1a2   :  { %1314 = vlog2.f32 %v767_v46  ;;  %v771_v55 = vadd.f32 1.0, %v770_v47  ;;  %vm774_vm1 = vcmp.lt.f32.partialorder %v773_v58, 0.0004427343 }
 0x1a3   :  { %v461_v52 = vmax.f32 %v404_v50, 0.0  ;;  %v641_v53 = vand.u32 2147483647, %v1820_v51 }
 0x1a4   :  { %v772_v62 = vmul.f32 %v1311_v44, %v771_v55 }
 0x1a5   :  { %1173 = vst [vmem:[#allocation2 + $0x130] sm:$0xff] %v461_v52  ;;  %v673_v57 = vsub.f32 0.0, %v641_v53  ;;  %567 = vmatmul.f32.gmra.mxu2 %v461_v52  ;;  %v609_v52 = vmax.f32 %v1820_v51, 0.0 }
 0x1a7   :  { %v1313_v59 = vpop.eup %1312  ;;  %v707_v60 = vmul.f32 1.442695, %v673_v57 }
 0x1a8   :  { %v1315_v61 = vpop.eup %1314  ;;  %v776_v0 = vadd.f32 1.0, %v1313_v59  ;;  %v779_v1 = vmul.f32 -0.5, %v1313_v59  ;;  %v406_v2 = vpop.f32.mrf.mxu1  ;;  %v782_v15 = vand.u32 2147483647, %v1313_v59 }
 0x1a9   :  { %v520_v3 = vpop.f32.mrf.mxu2  ;;  %v769_v4 = vmul.f32 0.6931472, %v1315_v61  ;;  %1316 = vpow2.f32 %v707_v60  ;;  %v407_v5 = vadd.f32 %v1768_v54, %v406_v2 }
 0x1aa   :  { %v1827_v6 = vadd.f32 %v1806_v36, %v520_v3  ;;  %1318 = vlog2.f32 %v776_v0  ;;  %v780_v12 = vadd.f32 1.0, %v779_v1  ;;  %vm783_vm3 = vcmp.lt.f32.partialorder %v782_v15, 0.0004427343 }
 0x1ab   :  { %v775_v8 = vsel %vm774_vm1, %v772_v62, %v769_v4  ;;  %v462_v9 = vmax.f32 %v407_v5, 0.0 }
 0x1ac   :  { %v642_v10 = vand.u32 2147483647, %v1827_v6  ;;  %v1055_v11 = vadd.f32 %v775_v8, %v607_v7  ;;  %v781_v20 = vmul.f32 %v1313_v59, %v780_v12 }
 0x1ad   :  { %1174 = vst [vmem:[#allocation2 + $0x140] sm:$0xff] %v462_v9  ;;  %570 = vmatmul.f32.gmra.mxu2 %v462_v9 }
 0x1ae   :  { %v674_v13 = vsub.f32 0.0, %v642_v10  ;;  %v1087_v14 = vadd.f32 1e-08, %v1055_v11  ;;  %v610_v11 = vmax.f32 %v1827_v6, 0.0 }
 0x1af   :  { %v1317_v16 = vpop.eup %1316 }
 0x1b0   :  { %v709_v17 = vmul.f32 1.442695, %v674_v13  ;;  %v1319_v18 = vpop.eup %1318  ;;  %v1122_v19 = vsel %vm1121_vm2, %v1087_v14, %v1810_v31  ;;  %v785_v21 = vadd.f32 1.0, %v1317_v16  ;;  %v788_v22 = vmul.f32 -0.5, %v1317_v16  ;;  %v409_v23 = vpop.f32.mrf.mxu1 }
 0x1b1   :  { %v523_v24 = vpop.f32.mrf.mxu2  ;;  %1186 = vst [vmem:[#allocation2 + $0x8] sm:$0xff] %v1122_v19  ;;  %v778_v25 = vmul.f32 0.6931472, %v1319_v18  ;;  %v410_v26 = vadd.f32 %v1768_v54, %v409_v23  ;;  %v791_v37 = vand.u32 2147483647, %v1317_v16 }
 0x1b2   :  { %1320 = vpow2.f32 %v709_v17  ;;  %v1837_v27 = vadd.f32 %v1806_v36, %v523_v24  ;;  %v789_v33 = vadd.f32 1.0, %v788_v22 }
 0x1b3   :  { %1322 = vlog2.f32 %v785_v21  ;;  %v784_v29 = vsel %vm783_vm3, %v781_v20, %v778_v25  ;;  %v463_v30 = vmax.f32 %v410_v26, 0.0  ;;  %vm792_vm4 = vcmp.lt.f32.partialorder %v791_v37, 0.0004427343 }
 0x1b4   :  { %v643_v31 = vand.u32 2147483647, %v1837_v27  ;;  %v1056_v32 = vadd.f32 %v784_v29, %v608_v28  ;;  %v790_v43 = vmul.f32 %v1317_v16, %v789_v33 }
 0x1b5   :  { %1175 = vst [vmem:[#allocation2 + $0x150] sm:$0xff] %v463_v30  ;;  %573 = vmatmul.f32.gmra.mxu2 %v463_v30  ;;  %v611_v30 = vmax.f32 %v1837_v27, 0.0 }
 0x1b6   :  { %v675_v34 = vsub.f32 0.0, %v643_v31  ;;  %v1088_v35 = vadd.f32 1e-08, %v1056_v32 }
 0x1b8   :  { %v1321_v38 = vpop.eup %1320  ;;  %v711_v39 = vmul.f32 1.442695, %v675_v34  ;;  %v1123_v42 = vsel %vm1121_vm2, %v1088_v35, %v1815_v40  ;;  %v412_v46 = vpop.f32.mrf.mxu1 }
 0x1b9   :  { %v1323_v41 = vpop.eup %1322  ;;  %v794_v44 = vadd.f32 1.0, %v1321_v38  ;;  %v797_v45 = vmul.f32 -0.5, %v1321_v38  ;;  %v526_v47 = vpop.f32.mrf.mxu2  ;;  %1187 = vst [vmem:[#allocation2 + $0x18] sm:$0xff] %v1123_v42  ;;  %v413_v49 = vadd.f32 %v1768_v54, %v412_v46  ;;  %v800_v60 = vand.u32 2147483647, %v1321_v38 }
 0x1ba   :  { %v787_v48 = vmul.f32 0.6931472, %v1323_v41  ;;  %1324 = vpow2.f32 %v711_v39  ;;  %v1846_v50 = vadd.f32 %v1806_v36, %v526_v47 }
 0x1bb   :  { %1326 = vlog2.f32 %v794_v44  ;;  %v464_v55 = vmax.f32 %v413_v49, 0.0  ;;  %v798_v57 = vadd.f32 1.0, %v797_v45  ;;  %vm801_vm5 = vcmp.lt.f32.partialorder %v800_v60, 0.0004427343 }
 0x1bc   :  { %v793_v53 = vsel %vm792_vm4, %v790_v43, %v787_v48  ;;  %v644_v40 = vand.u32 2147483647, %v1846_v50 }
 0x1bd   :  { %v1057_v56 = vadd.f32 %v793_v53, %v609_v52  ;;  %1176 = vst [vmem:[#allocation2 + $0x160] sm:$0xff] %v464_v55  ;;  %576 = vmatmul.f32.gmra.mxu2 %v464_v55  ;;  %v799_v2 = vmul.f32 %v1321_v38, %v798_v57  ;;  %v612_v55 = vmax.f32 %v1846_v50, 0.0 }
 0x1be   :  { %v676_v58 = vsub.f32 0.0, %v644_v40 }
 0x1bf   :  { %v1089_v59 = vadd.f32 1e-08, %v1057_v56 }
 0x1c0   :  { %v1325_v61 = vpop.eup %1324  ;;  %v713_v62 = vmul.f32 1.442695, %v676_v58  ;;  %v415_v5 = vpop.f32.mrf.mxu1 }
 0x1c1   :  { %v1327_v0 = vpop.eup %1326  ;;  %v1124_v1 = vsel %vm1121_vm2, %v1089_v59, %v1820_v51  ;;  %v803_v3 = vadd.f32 1.0, %v1325_v61  ;;  %v806_v4 = vmul.f32 -0.5, %v1325_v61  ;;  %v529_v7 = vpop.f32.mrf.mxu2  ;;  %v416_v9 = vadd.f32 %v1768_v54, %v415_v5 }
 0x1c2   :  { %1188 = vst [vmem:[#allocation2 + $0x28] sm:$0xff] %v1124_v1  ;;  %v796_v8 = vmul.f32 0.6931472, %v1327_v0  ;;  %1328 = vpow2.f32 %v713_v62  ;;  %v1855_v10 = vadd.f32 %v1806_v36, %v529_v7  ;;  %v809_v18 = vand.u32 2147483647, %v1325_v61 }
 0x1c3   :  { %1330 = vlog2.f32 %v803_v3  ;;  %v465_v13 = vmax.f32 %v416_v9, 0.0  ;;  %v807_v15 = vadd.f32 1.0, %v806_v4 }
 0x1c4   :  { %v802_v12 = vsel %vm801_vm5, %v799_v2, %v796_v8  ;;  %v645_v51 = vand.u32 2147483647, %v1855_v10  ;;  %vm810_vm6 = vcmp.lt.f32.partialorder %v809_v18, 0.0004427343 }
 0x1c5   :  { %v1058_v14 = vadd.f32 %v802_v12, %v610_v11  ;;  %1177 = vst [vmem:[#allocation2 + $0x170] sm:$0xff] %v465_v13  ;;  %579 = vmatmul.f32.gmra.mxu2 %v465_v13  ;;  %v808_v28 = vmul.f32 %v1325_v61, %v807_v15  ;;  %v613_v13 = vmax.f32 %v1855_v10, 0.0 }
 0x1c6   :  { %v677_v16 = vsub.f32 0.0, %v645_v51 }
 0x1c7   :  { %v1090_v17 = vadd.f32 1e-08, %v1058_v14 }
 0x1c8   :  { %v1329_v19 = vpop.eup %1328  ;;  %v715_v20 = vmul.f32 1.442695, %v677_v16 }
 0x1c9   :  { %v1331_v21 = vpop.eup %1330  ;;  %v1125_v22 = vsel %vm1121_vm2, %v1090_v17, %v1827_v6  ;;  %v812_v23 = vadd.f32 1.0, %v1329_v19  ;;  %v815_v24 = vmul.f32 -0.5, %v1329_v19  ;;  %v532_v25 = vpop.f32.mrf.mxu2  ;;  %v818_v37 = vand.u32 2147483647, %v1329_v19 }
 0x1ca   :  { %1189 = vst [vmem:[#allocation2 + $0x38] sm:$0xff] %v1125_v22  ;;  %v805_v26 = vmul.f32 0.6931472, %v1331_v21  ;;  %1332 = vpow2.f32 %v715_v20  ;;  %v1863_v29 = vadd.f32 %v1806_v36, %v532_v25 }
 0x1cb   :  { %1334 = vlog2.f32 %v812_v23  ;;  %v816_v34 = vadd.f32 1.0, %v815_v24  ;;  %vm819_vm7 = vcmp.lt.f32.partialorder %v818_v37, 0.0004427343 }
 0x1cc   :  { %v811_v31 = vsel %vm810_vm6, %v808_v28, %v805_v26  ;;  %v646_v32 = vand.u32 2147483647, %v1863_v29 }
 0x1cd   :  { %v1059_v33 = vadd.f32 %v811_v31, %v611_v30  ;;  %v817_v45 = vmul.f32 %v1329_v19, %v816_v34  ;;  %v614_v34 = vmax.f32 %v1863_v29, 0.0 }
 0x1ce   :  { %v678_v6 = vsub.f32 0.0, %v646_v32  ;;  %v418_v38 = vpop.f32.mrf.mxu3 }
 0x1cf   :  { %v1091_v35 = vadd.f32 1e-08, %v1059_v33  ;;  %v419_v42 = vadd.f32 %v1768_v54, %v418_v38 }
 0x1d0   :  { %v1333_v39 = vpop.eup %1332  ;;  %v717_v41 = vmul.f32 1.442695, %v678_v6 }
 0x1d1   :  { %v1335_v43 = vpop.eup %1334  ;;  %v1126_v44 = vsel %vm1121_vm2, %v1091_v35, %v1837_v27  ;;  %v821_v46 = vadd.f32 1.0, %v1333_v39  ;;  %v824_v47 = vmul.f32 -0.5, %v1333_v39  ;;  %v535_v48 = vpop.f32.mrf.mxu2  ;;  %v466_v52 = vmax.f32 %v419_v42, 0.0 }
 0x1d2   :  { %1190 = vst [vmem:[#allocation2 + $0x48] sm:$0xff] %v1126_v44  ;;  %v814_v49 = vmul.f32 0.6931472, %v1335_v43  ;;  %1336 = vpow2.f32 %v717_v41  ;;  %v1872_v53 = vadd.f32 %v1806_v36, %v535_v48  ;;  %v827_v60 = vand.u32 2147483647, %v1333_v39 }
 0x1d3   :  { %1338 = vlog2.f32 %v821_v46  ;;  %1178 = vst [vmem:[#allocation2 + $0x180] sm:$0xff] %v466_v52  ;;  %582 = vmatmul.f32.vlgmr.msra.gmra.mxu3 %v466_v52  ;;  %v825_v57 = vadd.f32 1.0, %v824_v47 }
 0x1d4   :  { %v820_v40 = vsel %vm819_vm7, %v817_v45, %v814_v49  ;;  %v647_v56 = vand.u32 2147483647, %v1872_v53  ;;  %vm828_vm8 = vcmp.lt.f32.partialorder %v827_v60, 0.0004427343 }
 0x1d5   :  { %v1060_v27 = vadd.f32 %v820_v40, %v612_v55  ;;  %v826_v4 = vmul.f32 %v1333_v39, %v825_v57  ;;  %v615_v57 = vmax.f32 %v1872_v53, 0.0 }
 0x1d6   :  { %v679_v58 = vsub.f32 0.0, %v647_v56  ;;  %v421_v61 = vpop.f32.mrf.mxu3 }
 0x1d7   :  { %v1092_v59 = vadd.f32 1e-08, %v1060_v27  ;;  %v422_v1 = vadd.f32 %v1768_v54, %v421_v61 }
 0x1d8   :  { %v1337_v62 = vpop.eup %1336  ;;  %v719_v0 = vmul.f32 1.442695, %v679_v58 }
 0x1d9   :  { %v1339_v2 = vpop.eup %1338  ;;  %v1127_v3 = vsel %vm1121_vm2, %v1092_v59, %v1846_v50  ;;  %v830_v5 = vadd.f32 1.0, %v1337_v62  ;;  %v833_v7 = vmul.f32 -0.5, %v1337_v62  ;;  %v538_v8 = vpop.f32.mrf.mxu2  ;;  %v467_v11 = vmax.f32 %v422_v1, 0.0 }
 0x1da   :  { %1191 = vst [vmem:[#allocation2 + $0x58] sm:$0xff] %v1127_v3  ;;  %v823_v9 = vmul.f32 0.6931472, %v1339_v2  ;;  %1340 = vpow2.f32 %v719_v0  ;;  %v1881_v12 = vadd.f32 %v1806_v36, %v538_v8  ;;  %v836_v18 = vand.u32 2147483647, %v1337_v62 }
 0x1db   :  { %1342 = vlog2.f32 %v830_v5  ;;  %1179 = vst [vmem:[#allocation2 + $0x190] sm:$0xff] %v467_v11  ;;  %585 = vmatmul.f32.gmra.mxu3 %v467_v11  ;;  %v834_v15 = vadd.f32 1.0, %v833_v7 }
 0x1dc   :  { %v829_v51 = vsel %vm828_vm8, %v826_v4, %v823_v9  ;;  %v648_v14 = vand.u32 2147483647, %v1881_v12  ;;  %vm837_vm9 = vcmp.lt.f32.partialorder %v836_v18, 0.0004427343 }
 0x1dd   :  { %v1061_v50 = vadd.f32 %v829_v51, %v613_v13  ;;  %v835_v25 = vmul.f32 %v1337_v62, %v834_v15  ;;  %v616_v15 = vmax.f32 %v1881_v12, 0.0 }
 0x1de   :  { %v680_v16 = vsub.f32 0.0, %v648_v14  ;;  %v424_v19 = vpop.f32.mrf.mxu3 }
 0x1df   :  { %v1093_v17 = vadd.f32 1e-08, %v1061_v50  ;;  %v425_v22 = vadd.f32 %v1768_v54, %v424_v19 }
 0x1e0   :  { %v1341_v20 = vpop.eup %1340  ;;  %v721_v21 = vmul.f32 1.442695, %v680_v16 }
 0x1e1   :  { %v1343_v23 = vpop.eup %1342  ;;  %v1128_v24 = vsel %vm1121_vm2, %v1093_v17, %v1855_v10  ;;  %v839_v26 = vadd.f32 1.0, %v1341_v20  ;;  %v842_v28 = vmul.f32 -0.5, %v1341_v20  ;;  %v541_v30 = vpop.f32.mrf.mxu2  ;;  %v468_v32 = vmax.f32 %v425_v22, 0.0 }
 0x1e2   :  { %1192 = vst [vmem:[#allocation2 + $0x68] sm:$0xff] %v1128_v24  ;;  %v832_v31 = vmul.f32 0.6931472, %v1343_v23  ;;  %1344 = vpow2.f32 %v721_v21  ;;  %v1890_v33 = vadd.f32 %v1806_v36, %v541_v30  ;;  %v845_v41 = vand.u32 2147483647, %v1341_v20 }
 0x1e3   :  { %1346 = vlog2.f32 %v839_v26  ;;  %1180 = vst [vmem:[#allocation2 + $0x1a0] sm:$0xff] %v468_v32  ;;  %588 = vmatmul.f32.gmra.mxu3 %v468_v32  ;;  %v843_v37 = vadd.f32 1.0, %v842_v28 }
 0x1e4   :  { %v838_v6 = vsel %vm837_vm9, %v835_v25, %v832_v31  ;;  %v649_v35 = vand.u32 2147483647, %v1890_v33  ;;  %vm846_vm10 = vcmp.lt.f32.partialorder %v845_v41, 0.0004427343 }
 0x1e5   :  { %v1062_v10 = vadd.f32 %v838_v6, %v614_v34  ;;  %v844_v48 = vmul.f32 %v1341_v20, %v843_v37  ;;  %v617_v37 = vmax.f32 %v1890_v33, 0.0 }
 0x1e6   :  { %v681_v38 = vsub.f32 0.0, %v649_v35  ;;  %v427_v42 = vpop.f32.mrf.mxu3 }
 0x1e7   :  { %v1094_v39 = vadd.f32 1e-08, %v1062_v10  ;;  %v428_v45 = vadd.f32 %v1768_v54, %v427_v42 }
 0x1e8   :  { %v1345_v43 = vpop.eup %1344  ;;  %v723_v44 = vmul.f32 1.442695, %v681_v38 }
 0x1e9   :  { %v1347_v46 = vpop.eup %1346  ;;  %v1129_v47 = vsel %vm1121_vm2, %v1094_v39, %v1863_v29  ;;  %v848_v49 = vadd.f32 1.0, %v1345_v43  ;;  %v851_v52 = vmul.f32 -0.5, %v1345_v43  ;;  %v544_v55 = vpop.f32.mrf.mxu2  ;;  %v469_v56 = vmax.f32 %v428_v45, 0.0 }
 0x1ea   :  { %1193 = vst [vmem:[#allocation2 + $0x78] sm:$0xff] %v1129_v47  ;;  %v841_v40 = vmul.f32 0.6931472, %v1347_v46  ;;  %1348 = vpow2.f32 %v723_v44  ;;  %v1899_v27 = vadd.f32 %v1806_v36, %v544_v55  ;;  %v854_v0 = vand.u32 2147483647, %v1345_v43 }
 0x1eb   :  { %1350 = vlog2.f32 %v848_v49  ;;  %1181 = vst [vmem:[#allocation2 + $0x1b0] sm:$0xff] %v469_v56  ;;  %591 = vmatmul.f32.gmra.mxu3 %v469_v56  ;;  %v852_v60 = vadd.f32 1.0, %v851_v52 }
 0x1ec   :  { %v847_v58 = vsel %vm846_vm10, %v844_v48, %v841_v40  ;;  %v650_v59 = vand.u32 2147483647, %v1899_v27  ;;  %vm855_vm11 = vcmp.lt.f32.partialorder %v854_v0, 0.0004427343 }
 0x1ed   :  { %v1063_v29 = vadd.f32 %v847_v58, %v615_v57  ;;  %v853_v8 = vmul.f32 %v1345_v43, %v852_v60  ;;  %v618_v60 = vmax.f32 %v1899_v27, 0.0 }
 0x1ee   :  { %v682_v61 = vsub.f32 0.0, %v650_v59  ;;  %v430_v1 = vpop.f32.mrf.mxu3 }
 0x1ef   :  { %v1095_v62 = vadd.f32 1e-08, %v1063_v29  ;;  %v431_v4 = vadd.f32 %v1768_v54, %v430_v1 }
 0x1f0   :  { %v1349_v2 = vpop.eup %1348  ;;  %v725_v3 = vmul.f32 1.442695, %v682_v61 }
 0x1f1   :  { %v1351_v5 = vpop.eup %1350  ;;  %v1130_v7 = vsel %vm1121_vm2, %v1095_v62, %v1872_v53  ;;  %v857_v9 = vadd.f32 1.0, %v1349_v2  ;;  %v860_v11 = vmul.f32 -0.5, %v1349_v2  ;;  %v547_v13 = vpop.f32.mrf.mxu2  ;;  %v470_v14 = vmax.f32 %v431_v4, 0.0 }
 0x1f2   :  { %1194 = vst [vmem:[#allocation2 + $0x88] sm:$0xff] %v1130_v7  ;;  %v850_v51 = vmul.f32 0.6931472, %v1351_v5  ;;  %1352 = vpow2.f32 %v725_v3  ;;  %v1908_v50 = vadd.f32 %v1806_v36, %v547_v13  ;;  %v863_v21 = vand.u32 2147483647, %v1349_v2 }
 0x1f3   :  { %1354 = vlog2.f32 %v857_v9  ;;  %1182 = vst [vmem:[#allocation2 + $0x1c0] sm:$0xff] %v470_v14  ;;  %594 = vmatmul.f32.gmra.mxu3 %v470_v14  ;;  %v861_v18 = vadd.f32 1.0, %v860_v11 }
 0x1f4   :  { %v856_v16 = vsel %vm855_vm11, %v853_v8, %v850_v51  ;;  %v651_v17 = vand.u32 2147483647, %v1908_v50  ;;  %vm864_vm12 = vcmp.lt.f32.partialorder %v863_v21, 0.0004427343 }
 0x1f5   :  { %v1064_v53 = vadd.f32 %v856_v16, %v616_v15  ;;  %v862_v30 = vmul.f32 %v1349_v2, %v861_v18  ;;  %v619_v18 = vmax.f32 %v1908_v50, 0.0 }
 0x1f6   :  { %v683_v19 = vsub.f32 0.0, %v651_v17  ;;  %v433_v22 = vpop.f32.mrf.mxu3 }
 0x1f7   :  { %v1096_v20 = vadd.f32 1e-08, %v1064_v53  ;;  %v434_v25 = vadd.f32 %v1768_v54, %v433_v22 }
 0x1f8   :  { %v1353_v23 = vpop.eup %1352  ;;  %v727_v24 = vmul.f32 1.442695, %v683_v19 }
 0x1f9   :  { %v1355_v26 = vpop.eup %1354  ;;  %v1131_v28 = vsel %vm1121_vm2, %v1096_v20, %v1881_v12  ;;  %v866_v31 = vadd.f32 1.0, %v1353_v23  ;;  %v869_v32 = vmul.f32 -0.5, %v1353_v23  ;;  %v550_v34 = vpop.f32.mrf.mxu2  ;;  %v471_v35 = vmax.f32 %v434_v25, 0.0 }
 0x1fa   :  { %1195 = vst [vmem:[#allocation2 + $0x98] sm:$0xff] %v1131_v28  ;;  %v859_v6 = vmul.f32 0.6931472, %v1355_v26  ;;  %1356 = vpow2.f32 %v727_v24  ;;  %v1917_v10 = vadd.f32 %v1806_v36, %v550_v34  ;;  %v872_v44 = vand.u32 2147483647, %v1353_v23 }
 0x1fb   :  { %1358 = vlog2.f32 %v866_v31  ;;  %1183 = vst [vmem:[#allocation2 + $0x1d0] sm:$0xff] %v471_v35  ;;  %597 = vmatmul.f32.gmra.mxu3 %v471_v35  ;;  %v870_v41 = vadd.f32 1.0, %v869_v32 }
 0x1fc   :  { %v865_v38 = vsel %vm864_vm12, %v862_v30, %v859_v6  ;;  %v652_v39 = vand.u32 2147483647, %v1917_v10  ;;  %vm873_vm13 = vcmp.lt.f32.partialorder %v872_v44, 0.0004427343 }
 0x1fd   :  { %v1065_v12 = vadd.f32 %v865_v38, %v617_v37  ;;  %v871_v55 = vmul.f32 %v1353_v23, %v870_v41  ;;  %v620_v37 = vmax.f32 %v1917_v10, 0.0 }
 0x1fe   :  { %v684_v42 = vsub.f32 0.0, %v652_v39  ;;  %v436_v45 = vpop.f32.mrf.mxu3 }
 0x1ff   :  { %v1097_v43 = vadd.f32 1e-08, %v1065_v12  ;;  %v437_v48 = vadd.f32 %v1768_v54, %v436_v45 }
 0x200   :  { %v1357_v46 = vpop.eup %1356  ;;  %v729_v47 = vmul.f32 1.442695, %v684_v42 }
 0x201   :  { %v1359_v49 = vpop.eup %1358  ;;  %v1132_v52 = vsel %vm1121_vm2, %v1097_v43, %v1890_v33  ;;  %v875_v40 = vadd.f32 1.0, %v1357_v46  ;;  %v878_v56 = vmul.f32 -0.5, %v1357_v46  ;;  %v553_v57 = vpop.f32.mrf.mxu2  ;;  %v472_v59 = vmax.f32 %v437_v48, 0.0 }
 0x202   :  { %1196 = vst [vmem:[#allocation2 + $0xa8] sm:$0xff] %v1132_v52  ;;  %v868_v58 = vmul.f32 0.6931472, %v1359_v49  ;;  %1360 = vpow2.f32 %v729_v47  ;;  %v1926_v29 = vadd.f32 %v1806_v36, %v553_v57  ;;  %v881_v3 = vand.u32 2147483647, %v1357_v46 }
 0x203   :  { %1362 = vlog2.f32 %v875_v40  ;;  %1184 = vst [vmem:[#allocation2 + $0x1e0] sm:$0xff] %v472_v59  ;;  %600 = vmatmul.f32.gmra.mxu3 %v472_v59  ;;  %v879_v0 = vadd.f32 1.0, %v878_v56 }
 0x204   :  { %v874_v61 = vsel %vm873_vm13, %v871_v55, %v868_v58  ;;  %v653_v62 = vand.u32 2147483647, %v1926_v29  ;;  %vm882_vm14 = vcmp.lt.f32.partialorder %v881_v3, 0.0004427343  ;;  %v621_v57 = vmax.f32 %v1926_v29, 0.0 }
 0x205   :  { %v1066_v33 = vadd.f32 %v874_v61, %v618_v60  ;;  %v880_v13 = vmul.f32 %v1357_v46, %v879_v0 }
 0x206   :  { %v685_v1 = vsub.f32 0.0, %v653_v62  ;;  %v439_v4 = vpop.f32.mrf.mxu3 }
 0x207   :  { %v1098_v2 = vadd.f32 1e-08, %v1066_v33  ;;  %v440_v8 = vadd.f32 %v1768_v54, %v439_v4 }
 0x208   :  { %v1361_v5 = vpop.eup %1360  ;;  %v731_v7 = vmul.f32 1.442695, %v685_v1 }
 0x209   :  { %v1363_v9 = vpop.eup %1362  ;;  %v1133_v11 = vsel %vm1121_vm2, %v1098_v2, %v1899_v27  ;;  %v884_v51 = vadd.f32 1.0, %v1361_v5  ;;  %v887_v14 = vmul.f32 -0.5, %v1361_v5  ;;  %v556_v15 = vpop.f32.mrf.mxu2  ;;  %v473_v17 = vmax.f32 %v440_v8, 0.0 }
 0x20a   :  { %1197 = vst [vmem:[#allocation2 + $0xb8] sm:$0xff] %v1133_v11  ;;  %v877_v16 = vmul.f32 0.6931472, %v1363_v9  ;;  %1364 = vpow2.f32 %v731_v7  ;;  %v1935_v53 = vadd.f32 %v1806_v36, %v556_v15  ;;  %v890_v23 = vand.u32 2147483647, %v1361_v5 }
 0x20b   :  { %1366 = vlog2.f32 %v884_v51  ;;  %1185 = vst [vmem:[#allocation2 + $0x1f0] sm:$0xff] %v473_v17  ;;  %603 = vmatmul.f32.gmra.mxu3 %v473_v17  ;;  %v888_v20 = vadd.f32 1.0, %v887_v14 }
 0x20c   :  { %v883_v54 = vsel %vm882_vm14, %v880_v13, %v877_v16  ;;  %v654_v19 = vand.u32 2147483647, %v1935_v53  ;;  %vm891_vm15 = vcmp.lt.f32.partialorder %v890_v23, 0.0004427343  ;;  %v622_v13 = vmax.f32 %v1935_v53, 0.0 }
 0x20d   :  { %v1067_v27 = vadd.f32 %v883_v54, %v619_v18  ;;  %v889_v6 = vmul.f32 %v1361_v5, %v888_v20 }
 0x20e   :  { %v686_v21 = vsub.f32 0.0, %v654_v19 }
 0x20f   :  { %v1099_v22 = vadd.f32 1e-08, %v1067_v27 }
 0x210   :  { %v1365_v24 = vpop.eup %1364  ;;  %v733_v25 = vmul.f32 1.442695, %v686_v21 }
 0x211   :  { %v1367_v26 = vpop.eup %1366  ;;  %v1134_v28 = vsel %vm1121_vm2, %v1099_v22, %v1908_v50  ;;  %v893_v30 = vadd.f32 1.0, %v1365_v24  ;;  %v896_v31 = vmul.f32 -0.5, %v1365_v24  ;;  %v559_v32 = vpop.f32.mrf.mxu2  ;;  %v899_v43 = vand.u32 2147483647, %v1365_v24 }
 0x212   :  { %1198 = vst [vmem:[#allocation2 + $0xc8] sm:$0xff] %v1134_v28  ;;  %v886_v34 = vmul.f32 0.6931472, %v1367_v26  ;;  %1368 = vpow2.f32 %v733_v25  ;;  %v1943_v35 = vadd.f32 %v1806_v36, %v559_v32 }
 0x213   :  { %1370 = vlog2.f32 %v893_v30  ;;  %v897_v41 = vadd.f32 1.0, %v896_v31  ;;  %vm900_vm0 = vcmp.lt.f32.partialorder %v899_v43, 0.0004427343 }
 0x214   :  { %v892_v38 = vsel %vm891_vm15, %v889_v6, %v886_v34  ;;  %v655_v39 = vand.u32 2147483647, %v1943_v35  ;;  %v623_v28 = vmax.f32 %v1943_v35, 0.0 }
 0x215   :  { %v1068_v12 = vadd.f32 %v892_v38, %v620_v37  ;;  %v898_v48 = vmul.f32 %v1365_v24, %v897_v41 }
 0x216   :  { %v687_v50 = vsub.f32 0.0, %v655_v39 }
 0x217   :  { %v1100_v42 = vadd.f32 1e-08, %v1068_v12 }
 0x218   :  { %v1369_v44 = vpop.eup %1368  ;;  %v735_v45 = vmul.f32 1.442695, %v687_v50 }
 0x219   :  { %v1371_v46 = vpop.eup %1370  ;;  %v1135_v47 = vsel %vm1121_vm2, %v1100_v42, %v1917_v10  ;;  %v902_v49 = vadd.f32 1.0, %v1369_v44  ;;  %v562_v52 = vpop.f32.mrf.mxu2  ;;  %v905_v40 = vmul.f32 -0.5, %v1369_v44  ;;  %v908_v33 = vand.u32 2147483647, %v1369_v44 }
 0x21a   :  { %1199 = vst [vmem:[#allocation2 + $0xd8] sm:$0xff] %v1135_v47  ;;  %v895_v55 = vmul.f32 0.6931472, %v1371_v46  ;;  %1372 = vpow2.f32 %v735_v45  ;;  %v1951_v56 = vadd.f32 %v1806_v36, %v562_v52 }
 0x21b   :  { %1374 = vlog2.f32 %v902_v49  ;;  %v906_v61 = vadd.f32 1.0, %v905_v40  ;;  %vm909_vm1 = vcmp.lt.f32.partialorder %v908_v33, 0.0004427343 }
 0x21c   :  { %v901_v58 = vsel %vm900_vm0, %v898_v48, %v895_v55  ;;  %v656_v59 = vand.u32 2147483647, %v1951_v56  ;;  %v624_v47 = vmax.f32 %v1951_v56, 0.0 }
 0x21d   :  { %v1069_v60 = vadd.f32 %v901_v58, %v621_v57  ;;  %v907_v9 = vmul.f32 %v1369_v44, %v906_v61 }
 0x21e   :  { %v688_v10 = vsub.f32 0.0, %v656_v59 }
 0x21f   :  { %v1101_v62 = vadd.f32 1e-08, %v1069_v60 }
 0x220   :  { %v1373_v0 = vpop.eup %1372  ;;  %v737_v1 = vmul.f32 1.442695, %v688_v10 }
 0x221   :  { %v1375_v2 = vpop.eup %1374  ;;  %v1136_v3 = vsel %vm1121_vm2, %v1101_v62, %v1926_v29  ;;  %v911_v4 = vadd.f32 1.0, %v1373_v0  ;;  %v914_v5 = vmul.f32 -0.5, %v1373_v0  ;;  %v565_v7 = vpop.f32.mrf.mxu2  ;;  %v917_v18 = vand.u32 2147483647, %v1373_v0 }
 0x222   :  { %1200 = vst [vmem:[#allocation2 + $0xe8] sm:$0xff] %v1136_v3  ;;  %v904_v8 = vmul.f32 0.6931472, %v1375_v2  ;;  %1376 = vpow2.f32 %v737_v1  ;;  %v1959_v11 = vadd.f32 %v1806_v36, %v565_v7 }
 0x223   :  { %1378 = vlog2.f32 %v911_v4  ;;  %v915_v16 = vadd.f32 1.0, %v914_v5  ;;  %vm918_vm3 = vcmp.lt.f32.partialorder %v917_v18, 0.0004427343 }
 0x224   :  { %v910_v51 = vsel %vm909_vm1, %v907_v9, %v904_v8  ;;  %v657_v14 = vand.u32 2147483647, %v1959_v11  ;;  %v625_v3 = vmax.f32 %v1959_v11, 0.0 }
 0x225   :  { %v1070_v15 = vadd.f32 %v910_v51, %v622_v13  ;;  %v916_v21 = vmul.f32 %v1373_v0, %v915_v16 }
 0x226   :  { %v689_v29 = vsub.f32 0.0, %v657_v14 }
 0x227   :  { %v1102_v17 = vadd.f32 1e-08, %v1070_v15 }
 0x228   :  { %v1377_v54 = vpop.eup %1376  ;;  %v739_v19 = vmul.f32 1.442695, %v689_v29 }
 0x229   :  { %v1379_v27 = vpop.eup %1378  ;;  %v1137_v20 = vsel %vm1121_vm2, %v1102_v17, %v1935_v53  ;;  %v920_v22 = vadd.f32 1.0, %v1377_v54  ;;  %v568_v23 = vpop.f32.mrf.mxu2  ;;  %v923_v25 = vmul.f32 -0.5, %v1377_v54  ;;  %v926_v37 = vand.u32 2147483647, %v1377_v54 }
 0x22a   :  { %1201 = vst [vmem:[#allocation2 + $0xf8] sm:$0xff] %v1137_v20  ;;  %v913_v24 = vmul.f32 0.6931472, %v1379_v27  ;;  %1380 = vpow2.f32 %v739_v19  ;;  %v1967_v26 = vadd.f32 %v1806_v36, %v568_v23  ;;  %v1993_v19 = vld [vmem:[%s2091_s6] ss:$0 sm:$0xff]  ;;  %s1465_s6 = smov [#allocation2]  }
 0x22b   :  { %1382 = vlog2.f32 %v920_v22  ;;  %v924_v34 = vadd.f32 1.0, %v923_v25  ;;  %vm927_vm4 = vcmp.lt.f32.partialorder %v926_v37, 0.0004427343  ;;  %s1222_s15 = sshll.u32 %s1465_s6, 4  ;;  %s1223_s15 = int_to_ptr.vmem [resolvable:$true] %s1222_s15 }
 0x22c   :  { %v919_v30 = vsel %vm918_vm3, %v916_v21, %v913_v24  ;;  %v658_v31 = vand.u32 2147483647, %v1967_v26  ;;  %v626_v20 = vmax.f32 %v1967_v26, 0.0 }
 0x22d   :  { %v1071_v32 = vadd.f32 %v919_v30, %v623_v28  ;;  %v925_v45 = vmul.f32 %v1377_v54, %v924_v34 }
 0x22e   :  { %v690_v53 = vsub.f32 0.0, %v658_v31 }
 0x22f   :  { %v1103_v6 = vadd.f32 1e-08, %v1071_v32 }
 0x230   :  { %v1381_v38 = vpop.eup %1380  ;;  %v741_v39 = vmul.f32 1.442695, %v690_v53 }
 0x231   :  { %v1383_v12 = vpop.eup %1382  ;;  %v1138_v41 = vsel %vm1121_vm2, %v1103_v6, %v1943_v35  ;;  %v929_v50 = vadd.f32 1.0, %v1381_v38  ;;  %v932_v42 = vmul.f32 -0.5, %v1381_v38  ;;  %v571_v43 = vpop.f32.mrf.mxu2  ;;  %v935_v57 = vand.u32 2147483647, %v1381_v38 }
 0x232   :  { %1202 = vst [vmem:[#allocation2 + $0x108] sm:$0xff] %v1138_v41  ;;  %v922_v44 = vmul.f32 0.6931472, %v1383_v12  ;;  %1384 = vpow2.f32 %v741_v39  ;;  %v1975_v46 = vadd.f32 %v1806_v36, %v571_v43 }
 0x233   :  { %1386 = vlog2.f32 %v929_v50  ;;  %v933_v55 = vadd.f32 1.0, %v932_v42  ;;  %vm936_vm5 = vcmp.lt.f32.partialorder %v935_v57, 0.0004427343 }
 0x234   :  { %v928_v48 = vsel %vm927_vm4, %v925_v45, %v922_v44  ;;  %v659_v49 = vand.u32 2147483647, %v1975_v46  ;;  %v627_v41 = vmax.f32 %v1975_v46, 0.0 }
 0x235   :  { %v1072_v52 = vadd.f32 %v928_v48, %v624_v47  ;;  %v934_v10 = vmul.f32 %v1381_v38, %v933_v55 }
 0x236   :  { %v691_v35 = vsub.f32 0.0, %v659_v49 }
 0x237   :  { %v1104_v40 = vadd.f32 1e-08, %v1072_v52 }
 0x238   :  { %v1385_v58 = vpop.eup %1384  ;;  %v743_v59 = vmul.f32 1.442695, %v691_v35 }
 0x239   :  { %v1387_v60 = vpop.eup %1386  ;;  %v1139_v61 = vsel %vm1121_vm2, %v1104_v40, %v1951_v56  ;;  %v938_v62 = vadd.f32 1.0, %v1385_v58  ;;  %v574_v33 = vpop.f32.mrf.mxu2  ;;  %v941_v1 = vmul.f32 -0.5, %v1385_v58  ;;  %v944_v13 = vand.u32 2147483647, %v1385_v58 }
 0x23a   :  { %1203 = vst [vmem:[#allocation2 + $0x118] sm:$0xff] %v1139_v61  ;;  %v931_v0 = vmul.f32 0.6931472, %v1387_v60  ;;  %1388 = vpow2.f32 %v743_v59  ;;  %v1983_v2 = vadd.f32 %v1806_v36, %v574_v33 }
 0x23b   :  { %1390 = vlog2.f32 %v938_v62  ;;  %v942_v8 = vadd.f32 1.0, %v941_v1  ;;  %vm945_vm6 = vcmp.lt.f32.partialorder %v944_v13, 0.0004427343 }
 0x23c   :  { %v937_v4 = vsel %vm936_vm5, %v934_v10, %v931_v0  ;;  %v660_v5 = vand.u32 2147483647, %v1983_v2  ;;  %v628_v59 = vmax.f32 %v1983_v2, 0.0 }
 0x23d   :  { %v1073_v7 = vadd.f32 %v937_v4, %v625_v3  ;;  %v943_v54 = vmul.f32 %v1385_v58, %v942_v8 }
 0x23e   :  { %v692_v56 = vsub.f32 0.0, %v660_v5 }
 0x23f   :  { %v1105_v9 = vadd.f32 1e-08, %v1073_v7 }
 0x240   :  { %v1389_v51 = vpop.eup %1388  ;;  %v745_v14 = vmul.f32 1.442695, %v692_v56 }
 0x241   :  { %v1391_v15 = vpop.eup %1390  ;;  %v1140_v36 = vsel %vm1121_vm2, %v1105_v9, %v1959_v11  ;;  %v947_v16 = vadd.f32 1.0, %v1389_v51  ;;  %v950_v29 = vmul.f32 -0.5, %v1389_v51  ;;  %v577_v17 = vpop.f32.mrf.mxu2  ;;  %v953_v28 = vand.u32 2147483647, %v1389_v51 }
 0x242   :  { %1204 = vst [vmem:[#allocation2 + $0x128] sm:$0xff] %v1140_v36  ;;  %v940_v18 = vmul.f32 0.6931472, %v1391_v15  ;;  %1392 = vpow2.f32 %v745_v14  ;;  %v1996_v27 = vadd.f32 %v1993_v19, %v577_v17 }
 0x243   :  { %1394 = vlog2.f32 %v947_v16  ;;  %v951_v23 = vadd.f32 1.0, %v950_v29  ;;  %vm954_vm7 = vcmp.lt.f32.partialorder %v953_v28, 0.0004427343 }
 0x244   :  { %v946_v11 = vsel %vm945_vm6, %v943_v54, %v940_v18  ;;  %v661_v21 = vand.u32 2147483647, %v1996_v27  ;;  %v629_v13 = vmax.f32 %v1996_v27, 0.0 }
 0x245   :  { %v1074_v22 = vadd.f32 %v946_v11, %v626_v20  ;;  %v952_v53 = vmul.f32 %v1389_v51, %v951_v23 }
 0x246   :  { %v693_v24 = vsub.f32 0.0, %v661_v21 }
 0x247   :  { %v1106_v25 = vadd.f32 1e-08, %v1074_v22 }
 0x248   :  { %v1393_v30 = vpop.eup %1392  ;;  %v747_v31 = vmul.f32 1.442695, %v693_v24 }
 0x249   :  { %v1395_v32 = vpop.eup %1394  ;;  %v1141_v34 = vsel %vm1121_vm2, %v1106_v25, %v1967_v26  ;;  %v956_v6 = vadd.f32 1.0, %v1393_v30  ;;  %v580_v37 = vpop.f32.mrf.mxu2  ;;  %v959_v39 = vmul.f32 -0.5, %v1393_v30  ;;  %v962_v47 = vand.u32 2147483647, %v1393_v30 }
 0x24a   :  { %1205 = vst [vmem:[#allocation2 + $0x138] sm:$0xff] %v1141_v34  ;;  %v949_v38 = vmul.f32 0.6931472, %v1395_v32  ;;  %1396 = vpow2.f32 %v747_v31  ;;  %v2004_v12 = vadd.f32 %v1993_v19, %v580_v37 }
 0x24b   :  { %1398 = vlog2.f32 %v956_v6  ;;  %v960_v44 = vadd.f32 1.0, %v959_v39  ;;  %vm963_vm8 = vcmp.lt.f32.partialorder %v962_v47, 0.0004427343 }
 0x24c   :  { %v955_v50 = vsel %vm954_vm7, %v952_v53, %v949_v38  ;;  %v662_v42 = vand.u32 2147483647, %v2004_v12  ;;  %v630_v23 = vmax.f32 %v2004_v12, 0.0 }
 0x24d   :  { %v1075_v43 = vadd.f32 %v955_v50, %v627_v41  ;;  %v961_v57 = vmul.f32 %v1393_v30, %v960_v44 }
 0x24e   :  { %v694_v26 = vsub.f32 0.0, %v662_v42 }
 0x24f   :  { %v1107_v45 = vadd.f32 1e-08, %v1075_v43 }
 0x250   :  { %v1397_v48 = vpop.eup %1396  ;;  %v749_v49 = vmul.f32 1.442695, %v694_v26 }
 0x251   :  { %v1399_v52 = vpop.eup %1398  ;;  %v1142_v55 = vsel %vm1121_vm2, %v1107_v45, %v1975_v46  ;;  %v965_v35 = vadd.f32 1.0, %v1397_v48  ;;  %v968_v58 = vmul.f32 -0.5, %v1397_v48  ;;  %v971_v33 = vand.u32 2147483647, %v1397_v48 }
 0x252   :  { %1206 = vst [vmem:[#allocation2 + $0x148] sm:$0xff] %v1142_v55  ;;  %v958_v40 = vmul.f32 0.6931472, %v1399_v52  ;;  %1400 = vpow2.f32 %v749_v49 }
 0x253   :  { %1402 = vlog2.f32 %v965_v35  ;;  %v969_v10 = vadd.f32 1.0, %v968_v58  ;;  %vm972_vm9 = vcmp.lt.f32.partialorder %v971_v33, 0.0004427343 }
 0x254   :  { %v964_v60 = vsel %vm963_vm8, %v961_v57, %v958_v40 }
 0x255   :  { %v1076_v61 = vadd.f32 %v964_v60, %v628_v59  ;;  %v970_v8 = vmul.f32 %v1397_v48, %v969_v10 }
 0x256   :  { %v583_v0 = vpop.f32.mrf.mxu3 }
 0x257   :  { %v1108_v62 = vadd.f32 1e-08, %v1076_v61  ;;  %v2013_v3 = vadd.f32 %v1993_v19, %v583_v0 }
 0x258   :  { %v1401_v1 = vpop.eup %1400 }
 0x259   :  { %v1403_v46 = vpop.eup %1402  ;;  %v1143_v4 = vsel %vm1121_vm2, %v1108_v62, %v1983_v2  ;;  %v974_v5 = vadd.f32 1.0, %v1401_v1  ;;  %v977_v56 = vmul.f32 -0.5, %v1401_v1  ;;  %v663_v9 = vand.u32 2147483647, %v2013_v3 }
 0x25a   :  { %1207 = vst [vmem:[#allocation2 + $0x158] sm:$0xff] %v1143_v4  ;;  %v967_v7 = vmul.f32 0.6931472, %v1403_v46  ;;  %v980_v17 = vand.u32 2147483647, %v1401_v1 }
 0x25b   :  { %1404 = vlog2.f32 %v974_v5  ;;  %v695_v14 = vsub.f32 0.0, %v663_v9  ;;  %v978_v36 = vadd.f32 1.0, %v977_v56 }
 0x25c   :  { %v973_v51 = vsel %vm972_vm9, %v970_v8, %v967_v7  ;;  %vm981_vm10 = vcmp.lt.f32.partialorder %v980_v17, 0.0004427343 }
 0x25d   :  { %v1077_v15 = vadd.f32 %v973_v51, %v629_v13  ;;  %v751_v16 = vmul.f32 1.442695, %v695_v14  ;;  %v979_v21 = vmul.f32 %v1401_v1, %v978_v36 }
 0x25e   :  { %v586_v18 = vpop.f32.mrf.mxu3 }
 0x25f   :  { %v1109_v29 = vadd.f32 1e-08, %v1077_v15  ;;  %1406 = vpow2.f32 %v751_v16  ;;  %v2021_v2 = vadd.f32 %v1993_v19, %v586_v18 }
 0x261   :  { %v1405_v54 = vpop.eup %1404  ;;  %v1144_v20 = vsel %vm1121_vm2, %v1109_v29, %v1996_v27  ;;  %v664_v22 = vand.u32 2147483647, %v2021_v2  ;;  %v632_v8 = vmax.f32 %v2021_v2, 0.0 }
 0x262   :  { %1208 = vst [vmem:[#allocation2 + $0x168] sm:$0xff] %v1144_v20  ;;  %v976_v11 = vmul.f32 0.6931472, %v1405_v54 }
 0x263   :  { %v696_v25 = vsub.f32 0.0, %v664_v22 }
 0x264   :  { %v982_v24 = vsel %vm981_vm10, %v979_v21, %v976_v11 }
 0x265   :  { %v1078_v28 = vadd.f32 %v982_v24, %v630_v23  ;;  %v1407_v30 = vpop.eup %1406  ;;  %v753_v31 = vmul.f32 1.442695, %v696_v25 }
 0x266   :  { %v983_v34 = vadd.f32 1.0, %v1407_v30  ;;  %v986_v53 = vmul.f32 -0.5, %v1407_v30  ;;  %v589_v6 = vpop.f32.mrf.mxu3  ;;  %v989_v50 = vand.u32 2147483647, %v1407_v30 }
 0x267   :  { %v1110_v32 = vadd.f32 1e-08, %v1078_v28  ;;  %1408 = vpow2.f32 %v753_v31  ;;  %v2029_v27 = vadd.f32 %v1993_v19, %v589_v6 }
 0x268   :  { %1410 = vlog2.f32 %v983_v34  ;;  %v987_v39 = vadd.f32 1.0, %v986_v53  ;;  %vm990_vm11 = vcmp.lt.f32.partialorder %v989_v50, 0.0004427343 }
 0x269   :  { %v1145_v37 = vsel %vm1121_vm2, %v1110_v32, %v2004_v12  ;;  %v665_v38 = vand.u32 2147483647, %v2029_v27  ;;  %v631_v12 = vmax.f32 %v2013_v3, 0.0  ;;  %v633_v23 = vmax.f32 %v2029_v27, 0.0 }
 0x26a   :  { %1209 = vst [vmem:[#allocation2 + $0x178] sm:$0xff] %v1145_v37  ;;  %v988_v26 = vmul.f32 %v1407_v30, %v987_v39 }
 0x26b   :  { %v697_v41 = vsub.f32 0.0, %v665_v38 }
 0x26d   :  { %v1409_v42 = vpop.eup %1408  ;;  %v755_v43 = vmul.f32 1.442695, %v697_v41 }
 0x26e   :  { %v1411_v44 = vpop.eup %1410  ;;  %v992_v45 = vadd.f32 1.0, %v1409_v42  ;;  %v592_v47 = vpop.f32.mrf.mxu3  ;;  %v995_v49 = vmul.f32 -0.5, %v1409_v42  ;;  %v998_v60 = vand.u32 2147483647, %v1409_v42 }
 0x26f   :  { %v985_v48 = vmul.f32 0.6931472, %v1411_v44  ;;  %1412 = vpow2.f32 %v755_v43  ;;  %v2036_v52 = vadd.f32 %v1993_v19, %v592_v47 }
 0x270   :  { %1414 = vlog2.f32 %v992_v45  ;;  %v996_v57 = vadd.f32 1.0, %v995_v49  ;;  %vm999_vm12 = vcmp.lt.f32.partialorder %v998_v60, 0.0004427343 }
 0x271   :  { %v991_v55 = vsel %vm990_vm11, %v988_v26, %v985_v48  ;;  %v666_v35 = vand.u32 2147483647, %v2036_v52  ;;  %v634_v44 = vmax.f32 %v2036_v52, 0.0 }
 0x272   :  { %v1079_v40 = vadd.f32 %v991_v55, %v631_v12  ;;  %v997_v5 = vmul.f32 %v1409_v42, %v996_v57 }
 0x273   :  { %v698_v58 = vsub.f32 0.0, %v666_v35 }
 0x274   :  { %v1111_v59 = vadd.f32 1e-08, %v1079_v40 }
 0x275   :  { %v1413_v61 = vpop.eup %1412  ;;  %v757_v10 = vmul.f32 1.442695, %v698_v58 }
 0x276   :  { %v1415_v62 = vpop.eup %1414  ;;  %v1146_v33 = vsel %vm1121_vm2, %v1111_v59, %v2013_v3  ;;  %v1001_v0 = vadd.f32 1.0, %v1413_v61  ;;  %v1004_v1 = vmul.f32 -0.5, %v1413_v61  ;;  %v595_v46 = vpop.f32.mrf.mxu3  ;;  %v1007_v15 = vand.u32 2147483647, %v1413_v61 }
 0x277   :  { %1210 = vst [vmem:[#allocation2 + $0x188] sm:$0xff] %v1146_v33  ;;  %v994_v4 = vmul.f32 0.6931472, %v1415_v62  ;;  %1416 = vpow2.f32 %v757_v10  ;;  %v2044_v7 = vadd.f32 %v1993_v19, %v595_v46 }
 0x278   :  { %1418 = vlog2.f32 %v1001_v0  ;;  %v1005_v51 = vadd.f32 1.0, %v1004_v1  ;;  %vm1008_vm13 = vcmp.lt.f32.partialorder %v1007_v15, 0.0004427343 }
 0x279   :  { %v1000_v56 = vsel %vm999_vm12, %v997_v5, %v994_v4  ;;  %v667_v9 = vand.u32 2147483647, %v2044_v7  ;;  %v635_v33 = vmax.f32 %v2044_v7, 0.0 }
 0x27a   :  { %v1080_v13 = vadd.f32 %v1000_v56, %v632_v8  ;;  %v1006_v18 = vmul.f32 %v1413_v61, %v1005_v51 }
 0x27b   :  { %v699_v3 = vsub.f32 0.0, %v667_v9 }
 0x27c   :  { %v1112_v14 = vadd.f32 1e-08, %v1080_v13 }
 0x27d   :  { %v1417_v36 = vpop.eup %1416  ;;  %v759_v16 = vmul.f32 1.442695, %v699_v3 }
 0x27e   :  { %v1419_v29 = vpop.eup %1418  ;;  %v1147_v17 = vsel %vm1121_vm2, %v1112_v14, %v2021_v2  ;;  %v1010_v54 = vadd.f32 1.0, %v1417_v36  ;;  %v598_v20 = vpop.f32.mrf.mxu3  ;;  %v1013_v21 = vmul.f32 -0.5, %v1417_v36  ;;  %v1016_v32 = vand.u32 2147483647, %v1417_v36 }
 0x27f   :  { %1211 = vst [vmem:[#allocation2 + $0x198] sm:$0xff] %v1147_v17  ;;  %v1003_v11 = vmul.f32 0.6931472, %v1419_v29  ;;  %1420 = vpow2.f32 %v759_v16  ;;  %v2052_v22 = vadd.f32 %v1993_v19, %v598_v20 }
 0x280   :  { %1422 = vlog2.f32 %v1010_v54  ;;  %v1014_v30 = vadd.f32 1.0, %v1013_v21  ;;  %vm1017_vm14 = vcmp.lt.f32.partialorder %v1016_v32, 0.0004427343 }
 0x281   :  { %v1009_v24 = vsel %vm1008_vm13, %v1006_v18, %v1003_v11  ;;  %v668_v25 = vand.u32 2147483647, %v2052_v22 }
 0x282   :  { %v1081_v28 = vadd.f32 %v1009_v24, %v633_v23  ;;  %v1015_v42 = vmul.f32 %v1417_v36, %v1014_v30  ;;  %v636_v36 = vmax.f32 %v2052_v22, 0.0 }
 0x283   :  { %v700_v2 = vsub.f32 0.0, %v668_v25 }
 0x284   :  { %v1113_v31 = vadd.f32 1e-08, %v1081_v28 }
 0x285   :  { %v1421_v34 = vpop.eup %1420  ;;  %v761_v53 = vmul.f32 1.442695, %v700_v2 }
 0x286   :  { %v1423_v6 = vpop.eup %1422  ;;  %v1148_v37 = vsel %vm1121_vm2, %v1113_v31, %v2029_v27  ;;  %v1019_v38 = vadd.f32 1.0, %v1421_v34  ;;  %v1022_v39 = vmul.f32 -0.5, %v1421_v34  ;;  %v601_v41 = vpop.f32.mrf.mxu3  ;;  %v1025_v12 = vand.u32 2147483647, %v1421_v34 }
 0x287   :  { %1212 = vst [vmem:[#allocation2 + $0x1a8] sm:$0xff] %v1148_v37  ;;  %v1012_v50 = vmul.f32 0.6931472, %v1423_v6  ;;  %1424 = vpow2.f32 %v761_v53  ;;  %v2060_v43 = vadd.f32 %v1993_v19, %v601_v41 }
 0x288   :  { %1426 = vlog2.f32 %v1019_v38  ;;  %v1023_v48 = vadd.f32 1.0, %v1022_v39  ;;  %vm1026_vm15 = vcmp.lt.f32.partialorder %v1025_v12, 0.0004427343 }
 0x289   :  { %v1018_v26 = vsel %vm1017_vm14, %v1015_v42, %v1012_v50  ;;  %v669_v45 = vand.u32 2147483647, %v2060_v43  ;;  %v637_v28 = vmax.f32 %v2060_v43, 0.0 }
 0x28a   :  { %v1082_v47 = vadd.f32 %v1018_v26, %v634_v44  ;;  %v1024_v58 = vmul.f32 %v1421_v34, %v1023_v48 }
 0x28b   :  { %v701_v27 = vsub.f32 0.0, %v669_v45 }
 0x28c   :  { %v1114_v49 = vadd.f32 1e-08, %v1082_v47 }
 0x28d   :  { %v1425_v55 = vpop.eup %1424  ;;  %v763_v35 = vmul.f32 1.442695, %v701_v27 }
 0x28e   :  { %v1427_v40 = vpop.eup %1426  ;;  %v1149_v57 = vsel %vm1121_vm2, %v1114_v49, %v2036_v52  ;;  %v1028_v59 = vadd.f32 1.0, %v1425_v55  ;;  %v604_v60 = vpop.f32.mrf.mxu3  ;;  %v1031_v10 = vmul.f32 -0.5, %v1425_v55  ;;  %v1034_v52 = vand.u32 2147483647, %v1425_v55 }
 0x28f   :  { %1213 = vst [vmem:[#allocation2 + $0x1b8] sm:$0xff] %v1149_v57  ;;  %v1021_v61 = vmul.f32 0.6931472, %v1427_v40  ;;  %1428 = vpow2.f32 %v763_v35  ;;  %v605_v62 = vadd.f32 %v1993_v19, %v604_v60 }
 0x290   :  { %1430 = vlog2.f32 %v1028_v59  ;;  %v1032_v4 = vadd.f32 1.0, %v1031_v10  ;;  %vm1035_vm0 = vcmp.lt.f32.partialorder %v1034_v52, 0.0004427343 }
 0x291   :  { %v1027_v0 = vsel %vm1026_vm15, %v1024_v58, %v1021_v61  ;;  %v670_v1 = vand.u32 2147483647, %v605_v62  ;;  %v638_v38 = vmax.f32 %v605_v62, 0.0 }
 0x292   :  { %v1083_v46 = vadd.f32 %v1027_v0, %v635_v33  ;;  %v1033_v14 = vmul.f32 %v1425_v55, %v1032_v4 }
 0x293   :  { %v702_v5 = vsub.f32 0.0, %v670_v1 }
 0x294   :  { %v1115_v8 = vadd.f32 1e-08, %v1083_v46 }
 0x295   :  { %v1429_v56 = vpop.eup %1428  ;;  %v765_v9 = vmul.f32 1.442695, %v702_v5 }
 0x296   :  { %v1431_v13 = vpop.eup %1430  ;;  %v1150_v51 = vsel %vm1121_vm2, %v1115_v8, %v2044_v7  ;;  %v1037_v3 = vadd.f32 1.0, %v1429_v56  ;;  %v1040_v15 = vmul.f32 -0.5, %v1429_v56  ;;  %v1043_v54 = vand.u32 2147483647, %v1429_v56 }
 0x297   :  { %1214 = vst [vmem:[#allocation2 + $0x1c8] sm:$0xff] %v1150_v51  ;;  %v1030_v19 = vmul.f32 0.6931472, %v1431_v13  ;;  %1432 = vpow2.f32 %v765_v9 }
 0x298   :  { %1434 = vlog2.f32 %v1037_v3  ;;  %v1041_v17 = vadd.f32 1.0, %v1040_v15  ;;  %vm1044_vm1 = vcmp.lt.f32.partialorder %v1043_v54, 0.0004427343 }
 0x299   :  { %v1036_v16 = vsel %vm1035_vm0, %v1033_v14, %v1030_v19 }
 0x29a   :  { %v1084_v29 = vadd.f32 %v1036_v16, %v636_v36  ;;  %v1042_v24 = vmul.f32 %v1429_v56, %v1041_v17 }
 0x29c   :  { %v1116_v18 = vadd.f32 1e-08, %v1084_v29 }
 0x29d   :  { %v1433_v20 = vpop.eup %1432 }
 0x29e   :  { %v1435_v11 = vpop.eup %1434  ;;  %v1151_v7 = vsel %vm1121_vm2, %v1116_v18, %v2052_v22  ;;  %v1046_v21 = vadd.f32 1.0, %v1433_v20  ;;  %v1049_v25 = vmul.f32 -0.5, %v1433_v20  ;;  %v1052_v34 = vand.u32 2147483647, %v1433_v20 }
 0x29f   :  { %1215 = vst [vmem:[#allocation2 + $0x1d8] sm:$0xff] %v1151_v7  ;;  %v1039_v23 = vmul.f32 0.6931472, %v1435_v11 }
 0x2a0   :  { %1436 = vlog2.f32 %v1046_v21  ;;  %v1050_v31 = vadd.f32 1.0, %v1049_v25  ;;  %vm1053_vm3 = vcmp.lt.f32.partialorder %v1052_v34, 0.0004427343 }
 0x2a1   :  { %v1045_v30 = vsel %vm1044_vm1, %v1042_v24, %v1039_v23 }
 0x2a2   :  { %v1085_v2 = vadd.f32 %v1045_v30, %v637_v28  ;;  %v1051_v37 = vmul.f32 %v1433_v20, %v1050_v31 }
 0x2a4   :  { %v1117_v32 = vadd.f32 1e-08, %v1085_v2 }
 0x2a6   :  { %v1437_v53 = vpop.eup %1436  ;;  %v1152_v6 = vsel %vm1121_vm2, %v1117_v32, %v2060_v43 }
 0x2a7   :  { %1216 = vst [vmem:[#allocation2 + $0x1e8] sm:$0xff] %v1152_v6  ;;  %v1048_v22 = vmul.f32 0.6931472, %v1437_v53 }
 0x2a9   :  { %v1054_v39 = vsel %vm1053_vm3, %v1051_v37, %v1048_v22 }
 0x2aa   :  { %v1086_v41 = vadd.f32 %v1054_v39, %v638_v38 }
 0x2ac   :  { %v1118_v50 = vadd.f32 1e-08, %v1086_v41 }
 0x2ae   :  { %v1153_v42 = vsel %vm1121_vm2, %v1118_v50, %v605_v62 }
 0x2af   :  { %1217 = vst [vmem:[#allocation2 + $0x1f8] sm:$0xff] %v1153_v42 }
 0x2b0   :  { %1230 = dma.vmem_to_hbm [thread:$0]  %s1223_s15, 8192, %s1225_s18, [#allocation3], %s1466_s19, %s1466_s19, %s1467_s20  }
 0x2b1   :  { %1463 = dma.done.wait [#allocation3], 8192  }
 0x2b2   :  { %1464 = vsyncadd [#allocation3], 4294959104 }
 0x2b3   :  { %1235 = vsyncpa [#allocation3], 1 }

</bundles_post_ra>
